<compile_context>
chip_gen: v7x
topology: tpu7x:2x2x1
jax: 0.10.0
libtpu: 0.0.40
codegen_flags: <defaults>
</compile_context>

<pallas_src>
import jax
import jax.numpy as jnp
from jax.experimental import pallas as pl
from jax.experimental.pallas import tpu as pltpu

KSIZE = 7
PAD = KSIZE // 2  # 3


def _round_up(v, m):
    return ((v + m - 1) // m) * m


def _channel_chunk(c):
    """Largest divisor of c that is <= 8 (channel-reduction chunk size)."""
    return max(d for d in range(1, min(c, 8) + 1) if c % d == 0)


def _vmem_capacity_bytes():
    try:
        return int(pltpu.get_tpu_info().vmem_capacity_bytes)
    except Exception:
        return 64 * 1024 * 1024          # conservative fallback (v7x per-core)


def _spatial_attention_kernel(x_ref, k_ref, b_ref, o_ref):
    # x_ref : (bt, C, H, W)              VMEM input block (bt images)
    # k_ref : (2*KSIZE*Wp, Wp)           VMEM banded-Toeplitz table (constant)
    # b_ref : (1,)                       SMEM conv bias
    # o_ref : (bt, 1, H, Wp)             VMEM lane-dense output block
    bt, C, H, W = x_ref.shape
    Wp = k_ref.shape[1]

    # ---- fused channel max + mean: chunked single pass over C, f32 acc -----
    ck = _channel_chunk(C)
    nchunk = C // ck
    first = x_ref[:, 0:ck, :, :].astype(jnp.float32)          # (bt, ck, H, W)
    mx = jnp.max(first, axis=1)                                # (bt, H, W)
    sm = jnp.sum(first, axis=1)
    if nchunk > 1:
        def body(i, carry):
            m, s = carry
            off = pl.multiple_of(i * ck, ck)
            chunk = x_ref[:, pl.ds(off, ck), :, :].astype(jnp.float32)
            return (jnp.maximum(m, jnp.max(chunk, axis=1)),
                    s + jnp.sum(chunk, axis=1))
        mx, sm = jax.lax.fori_loop(1, nchunk, body, (mx, sm),
                                   unroll=min(4, nchunk - 1))
    avg = sm * (1.0 / C)

    # ---- lane-pad to Wp and concatenate the two conv input channels --------
    if Wp != W:
        zlane = jnp.zeros((bt, H, Wp - W), jnp.float32)
        cat = jnp.concatenate([mx, zlane, avg, zlane], axis=-1)   # (bt,H,2*Wp)
    else:
        cat = jnp.concatenate([mx, avg], axis=-1)

    # ---- 7 row shifts via sublane rolls (XLU), one lane-concat, ONE matmul -
    row = jax.lax.broadcasted_iota(jnp.int32, (1, H, 1), 1)
    parts = []
    for ky in range(KSIZE):                                    # 7, static
        d = ky - PAD                                           # source row = y + d
        if d == 0:
            parts.append(cat)
        else:
            rolled = pltpu.roll(cat, shift=(-d) % H, axis=1)
            valid = jnp.logical_and(row + d >= 0, row + d < H)
            parts.append(jnp.where(valid, rolled, 0.0))
    stack = jnp.concatenate(parts, axis=-1)                    # (bt, H, 14*Wp)

    acc = jnp.dot(stack.reshape(bt * H, 2 * KSIZE * Wp), k_ref[...],
                  preferred_element_type=jnp.float32) + b_ref[0]
    o_ref[...] = jax.nn.sigmoid(acc).reshape(bt, 1, H, Wp).astype(o_ref.dtype)


def _conv_as_toeplitz(weight, W, Wp):
    """weight (1, 2, 7, 7) OIHW -> single banded matrix (2*KSIZE*Wp, Wp).

    K[ky*2*Wp + c*Wp + j_src, j_out] = weight[0, c, ky, j_src - j_out + PAD]
    (zero outside the 7-tap band and outside the valid [0, W) columns), so
    that the row-shifted [max | avg] stack (bt*H, 14*Wp) @ K reproduces the
    2-channel 7x7 cross-correlation with SAME padding, lane-padded to Wp.
    """
    w = jnp.asarray(weight, jnp.float32)[0]                    # (2, 7, 7)
    j_src = jnp.arange(Wp)[:, None]
    j_out = jnp.arange(Wp)[None, :]
    kx = j_src - j_out + PAD                                   # (Wp, Wp)
    valid = (kx >= 0) & (kx < KSIZE) & (j_src < W) & (j_out < W)
    taps = w[:, :, jnp.clip(kx, 0, KSIZE - 1)]                 # (2, 7, Wp, Wp)
    t = jnp.where(valid[None, None], taps, 0.0)
    # Row layout must match the stack: ky-major, channel (max, avg) inner.
    return jnp.transpose(t, (1, 0, 2, 3)).reshape(KSIZE * 2 * Wp, Wp)


def _choose_tiling(B, C, H, W, Wp, in_itemsize, out_itemsize):
    """Generation-aware batch-block size + VMEM limit."""
    Hs = _round_up(H, 8)                 # sublane-padded rows (VMEM layout)
    ck = _channel_chunk(C)
    cap = _vmem_capacity_bytes()
    budget = cap // 2                    # ~32 MiB on v7x, ~64 MiB on v5e/v6e

    def need(bt):
        in_blk = 2 * bt * C * Hs * Wp * in_itemsize     # double-buffered input
        out_blk = 2 * bt * 1 * Hs * Wp * out_itemsize   # double-buffered output
        table = (2 * KSIZE * Wp) * Wp * 4               # single-buffered table
        temps = 4 * bt * Hs * Wp * (ck + 35)            # f32 value temporaries
        return in_blk + out_blk + table + temps

    bt = 1
    for d in range(1, B + 1):
        if B % d != 0 or need(d) > budget:
            continue
        if B > 1 and B // d < 2:         # keep >= 2 grid steps (2 TCs on v7x)
            continue
        bt = d
    limit = int(min(cap, max(need(bt) + (8 << 20), 32 << 20)))
    return bt, limit


def spatial_attention(x, weight, bias):
    """x: (B, C, H, W); weight: (1, 2, 7, 7); bias: (1,). Returns (B, 1, H, W)."""
    B, C, H, W = x.shape
    Wp = _round_up(W, 128)                                     # lane-dense width
    k_toe = _conv_as_toeplitz(weight, W, Wp)                   # (14*Wp, Wp) f32
    bias_arr = jnp.asarray(bias, jnp.float32).reshape((1,))
    bt, vmem_limit = _choose_tiling(B, C, H, W, Wp,
                                    x.dtype.itemsize, x.dtype.itemsize)

    out = pl.pallas_call(
        _spatial_attention_kernel,
        out_shape=jax.ShapeDtypeStruct((B, 1, H, Wp), x.dtype),
        grid_spec=pltpu.PrefetchScalarGridSpec(
            num_scalar_prefetch=0,
            grid=(B // bt,),
            in_specs=[
                pl.BlockSpec((bt, C, H, W), lambda b: (b, 0, 0, 0)),
                pl.BlockSpec((2 * KSIZE * Wp, Wp), lambda b: (0, 0),
                             pipeline_mode=pl.Buffered(1)),    # constant table
                pl.BlockSpec(memory_space=pltpu.MemorySpace.SMEM),
            ],
            out_specs=pl.BlockSpec((bt, 1, H, Wp), lambda b: (b, 0, 0, 0)),
        ),
        compiler_params=pltpu.CompilerParams(
            dimension_semantics=("parallel",),
            vmem_limit_bytes=vmem_limit),
    )(x, k_toe, bias_arr)
    return out[..., :W]                                        # drop lane padding


def spatial_attention_ref(x, weight, bias):
    """Pure-JAX reference mirroring the PyTorch forward."""
    max_r = jnp.max(x, axis=1, keepdims=True)
    avg_r = jnp.mean(x, axis=1, keepdims=True)
    result = jnp.concatenate([max_r, avg_r], axis=1)           # (B, 2, H, W)
    out = jax.lax.conv_general_dilated(
        result, weight, window_strides=(1, 1),
        padding=[(PAD, PAD), (PAD, PAD)],
        dimension_numbers=("NCHW", "OIHW", "NCHW"))
    out = out + bias.reshape(1, 1, 1, 1)
    return jax.nn.sigmoid(out)


if __name__ == "__main__":
    key = jax.random.PRNGKey(0)
    key_x, key_w, key_b = jax.random.split(key, 3)

    B, C, H, W = 2, 4, 16, 16
    x = jax.random.normal(key_x, (B, C, H, W), dtype=jnp.float32)

    # Deterministic synthetic Conv2d(2, 1, 7, padding=3) parameters.
    fan_in = 2 * KSIZE * KSIZE
    bound = 1.0 / (fan_in ** 0.5)
    weight = jax.random.uniform(key_w, (1, 2, KSIZE, KSIZE),
                                minval=-bound, maxval=bound, dtype=jnp.float32)
    bias = jax.random.uniform(key_b, (1,), minval=-bound, maxval=bound,
                              dtype=jnp.float32)

    out = spatial_attention(x, weight, bias)
    out = jax.block_until_ready(out)

    ref = spatial_attention_ref(x, weight, bias)
    assert out.shape == (B, 1, H, W), out.shape
    max_err = float(jnp.max(jnp.abs(out - ref)))
    assert jnp.allclose(out, ref, atol=1e-5, rtol=1e-5), max_err

    print("KERNEL_OK")
</pallas_src>

<mosaic_0001>
module attributes {stable_mosaic.version = 11 : i64} {
  func.func @_spatial_attention_kernel(%arg0: i32, %arg1: memref<1x4x16x16xf32, #tpu.memory_space<vmem>>, %arg2: memref<1792x128xf32, #tpu.memory_space<vmem>>, %arg3: memref<1xf32, #tpu.memory_space<smem>>, %arg4: memref<1x1x16x128xf32, #tpu.memory_space<vmem>>) attributes {dimension_semantics = [#tpu.dimension_semantics<parallel>], iteration_bounds = array<i64: 2>, scalar_prefetch = 0 : i64, scratch_operands = 0 : i64, tpu.core_type = #tpu.core_type<tc>, window_params = [{transform_indices = @transform_0, window_bounds = array<i64: 1, 4, 16, 16>}, {pipeline_mode = #tpu.pipeline_mode<synchronous>, transform_indices = @transform_1, window_bounds = array<i64: 1792, 128>}, {transform_indices = @transform_2, window_bounds = array<i64: 1>}, {transform_indices = @transform_3, window_bounds = array<i64: 1, 1, 16, 128>}]} {
    %c0 = arith.constant 0 : index
    %c0_0 = arith.constant 0 : index
    %c0_1 = arith.constant 0 : index
    %c0_2 = arith.constant 0 : index
    %0 = vector.load %arg1[%c0, %c0_0, %c0_1, %c0_2] : memref<1x4x16x16xf32, #tpu.memory_space<vmem>>, vector<1x4x16x16xf32>
    %cst = arith.constant dense<0xFF800000> : vector<1x16x16xf32>
    %1 = vector.multi_reduction <maximumf>, %0, %cst [1] : vector<1x4x16x16xf32> to vector<1x16x16xf32>
    %cst_3 = arith.constant dense<0.000000e+00> : vector<1x16x16xf32>
    %2 = vector.multi_reduction <add>, %0, %cst_3 [1] : vector<1x4x16x16xf32> to vector<1x16x16xf32>
    %cst_4 = arith.constant 2.500000e-01 : f32
    %3 = vector.broadcast %cst_4 : f32 to vector<1x16x16xf32>
    %4 = arith.mulf %2, %3 : vector<1x16x16xf32>
    %cst_5 = arith.constant 0.000000e+00 : f32
    %5 = vector.broadcast %cst_5 : f32 to vector<1x16x112xf32>
    %6 = tpu.concatenate %1, %5, %4, %5 in 2 : vector<1x16x16xf32>, vector<1x16x112xf32>, vector<1x16x16xf32>, vector<1x16x112xf32> -> vector<1x16x256xf32>
    %7 = tpu.iota {dimensions = array<i32: 1>} : vector<1x16x1xi32>
    %c3_i32 = arith.constant 3 : i32
    %8 = tpu.dynamic_rotate %6 by %c3_i32 dim 1 : vector<1x16x256xf32>, i32 -> vector<1x16x256xf32>
    %c-3_i32 = arith.constant -3 : i32
    %9 = vector.broadcast %c-3_i32 : i32 to vector<1x16x1xi32>
    %10 = arith.addi %7, %9 : vector<1x16x1xi32>
    %c0_i32 = arith.constant 0 : i32
    %11 = vector.broadcast %c0_i32 : i32 to vector<1x16x1xi32>
    %12 = arith.cmpi sge, %10, %11 : vector<1x16x1xi32>
    %c-3_i32_6 = arith.constant -3 : i32
    %13 = vector.broadcast %c-3_i32_6 : i32 to vector<1x16x1xi32>
    %14 = arith.addi %7, %13 : vector<1x16x1xi32>
    %c16_i32 = arith.constant 16 : i32
    %15 = vector.broadcast %c16_i32 : i32 to vector<1x16x1xi32>
    %16 = arith.cmpi slt, %14, %15 : vector<1x16x1xi32>
    %17 = arith.andi %12, %16 : vector<1x16x1xi1>
    %cst_7 = arith.constant 0.000000e+00 : f32
    %18 = vector.shape_cast %17 : vector<1x16x1xi1> to vector<1x16x1xi1>
    %19 = vector.broadcast %18 : vector<1x16x1xi1> to vector<1x16x256xi1>
    %20 = vector.broadcast %cst_7 : f32 to vector<1x16x256xf32>
    %21 = arith.select %19, %8, %20 : vector<1x16x256xi1>, vector<1x16x256xf32>
    %c2_i32 = arith.constant 2 : i32
    %22 = tpu.dynamic_rotate %6 by %c2_i32 dim 1 : vector<1x16x256xf32>, i32 -> vector<1x16x256xf32>
    %c-2_i32 = arith.constant -2 : i32
    %23 = vector.broadcast %c-2_i32 : i32 to vector<1x16x1xi32>
    %24 = arith.addi %7, %23 : vector<1x16x1xi32>
    %c0_i32_8 = arith.constant 0 : i32
    %25 = vector.broadcast %c0_i32_8 : i32 to vector<1x16x1xi32>
    %26 = arith.cmpi sge, %24, %25 : vector<1x16x1xi32>
    %c-2_i32_9 = arith.constant -2 : i32
    %27 = vector.broadcast %c-2_i32_9 : i32 to vector<1x16x1xi32>
    %28 = arith.addi %7, %27 : vector<1x16x1xi32>
    %c16_i32_10 = arith.constant 16 : i32
    %29 = vector.broadcast %c16_i32_10 : i32 to vector<1x16x1xi32>
    %30 = arith.cmpi slt, %28, %29 : vector<1x16x1xi32>
    %31 = arith.andi %26, %30 : vector<1x16x1xi1>
    %cst_11 = arith.constant 0.000000e+00 : f32
    %32 = vector.shape_cast %31 : vector<1x16x1xi1> to vector<1x16x1xi1>
    %33 = vector.broadcast %32 : vector<1x16x1xi1> to vector<1x16x256xi1>
    %34 = vector.broadcast %cst_11 : f32 to vector<1x16x256xf32>
    %35 = arith.select %33, %22, %34 : vector<1x16x256xi1>, vector<1x16x256xf32>
    %c1_i32 = arith.constant 1 : i32
    %36 = tpu.dynamic_rotate %6 by %c1_i32 dim 1 : vector<1x16x256xf32>, i32 -> vector<1x16x256xf32>
    %c-1_i32 = arith.constant -1 : i32
    %37 = vector.broadcast %c-1_i32 : i32 to vector<1x16x1xi32>
    %38 = arith.addi %7, %37 : vector<1x16x1xi32>
    %c0_i32_12 = arith.constant 0 : i32
    %39 = vector.broadcast %c0_i32_12 : i32 to vector<1x16x1xi32>
    %40 = arith.cmpi sge, %38, %39 : vector<1x16x1xi32>
    %c-1_i32_13 = arith.constant -1 : i32
    %41 = vector.broadcast %c-1_i32_13 : i32 to vector<1x16x1xi32>
    %42 = arith.addi %7, %41 : vector<1x16x1xi32>
    %c16_i32_14 = arith.constant 16 : i32
    %43 = vector.broadcast %c16_i32_14 : i32 to vector<1x16x1xi32>
    %44 = arith.cmpi slt, %42, %43 : vector<1x16x1xi32>
    %45 = arith.andi %40, %44 : vector<1x16x1xi1>
    %cst_15 = arith.constant 0.000000e+00 : f32
    %46 = vector.shape_cast %45 : vector<1x16x1xi1> to vector<1x16x1xi1>
    %47 = vector.broadcast %46 : vector<1x16x1xi1> to vector<1x16x256xi1>
    %48 = vector.broadcast %cst_15 : f32 to vector<1x16x256xf32>
    %49 = arith.select %47, %36, %48 : vector<1x16x256xi1>, vector<1x16x256xf32>
    %c15_i32 = arith.constant 15 : i32
    %50 = tpu.dynamic_rotate %6 by %c15_i32 dim 1 : vector<1x16x256xf32>, i32 -> vector<1x16x256xf32>
    %c1_i32_16 = arith.constant 1 : i32
    %51 = vector.broadcast %c1_i32_16 : i32 to vector<1x16x1xi32>
    %52 = arith.addi %7, %51 : vector<1x16x1xi32>
    %c0_i32_17 = arith.constant 0 : i32
    %53 = vector.broadcast %c0_i32_17 : i32 to vector<1x16x1xi32>
    %54 = arith.cmpi sge, %52, %53 : vector<1x16x1xi32>
    %c1_i32_18 = arith.constant 1 : i32
    %55 = vector.broadcast %c1_i32_18 : i32 to vector<1x16x1xi32>
    %56 = arith.addi %7, %55 : vector<1x16x1xi32>
    %c16_i32_19 = arith.constant 16 : i32
    %57 = vector.broadcast %c16_i32_19 : i32 to vector<1x16x1xi32>
    %58 = arith.cmpi slt, %56, %57 : vector<1x16x1xi32>
    %59 = arith.andi %54, %58 : vector<1x16x1xi1>
    %cst_20 = arith.constant 0.000000e+00 : f32
    %60 = vector.shape_cast %59 : vector<1x16x1xi1> to vector<1x16x1xi1>
    %61 = vector.broadcast %60 : vector<1x16x1xi1> to vector<1x16x256xi1>
    %62 = vector.broadcast %cst_20 : f32 to vector<1x16x256xf32>
    %63 = arith.select %61, %50, %62 : vector<1x16x256xi1>, vector<1x16x256xf32>
    %c14_i32 = arith.constant 14 : i32
    %64 = tpu.dynamic_rotate %6 by %c14_i32 dim 1 : vector<1x16x256xf32>, i32 -> vector<1x16x256xf32>
    %c2_i32_21 = arith.constant 2 : i32
    %65 = vector.broadcast %c2_i32_21 : i32 to vector<1x16x1xi32>
    %66 = arith.addi %7, %65 : vector<1x16x1xi32>
    %c0_i32_22 = arith.constant 0 : i32
    %67 = vector.broadcast %c0_i32_22 : i32 to vector<1x16x1xi32>
    %68 = arith.cmpi sge, %66, %67 : vector<1x16x1xi32>
    %c2_i32_23 = arith.constant 2 : i32
    %69 = vector.broadcast %c2_i32_23 : i32 to vector<1x16x1xi32>
    %70 = arith.addi %7, %69 : vector<1x16x1xi32>
    %c16_i32_24 = arith.constant 16 : i32
    %71 = vector.broadcast %c16_i32_24 : i32 to vector<1x16x1xi32>
    %72 = arith.cmpi slt, %70, %71 : vector<1x16x1xi32>
    %73 = arith.andi %68, %72 : vector<1x16x1xi1>
    %cst_25 = arith.constant 0.000000e+00 : f32
    %74 = vector.shape_cast %73 : vector<1x16x1xi1> to vector<1x16x1xi1>
    %75 = vector.broadcast %74 : vector<1x16x1xi1> to vector<1x16x256xi1>
    %76 = vector.broadcast %cst_25 : f32 to vector<1x16x256xf32>
    %77 = arith.select %75, %64, %76 : vector<1x16x256xi1>, vector<1x16x256xf32>
    %c13_i32 = arith.constant 13 : i32
    %78 = tpu.dynamic_rotate %6 by %c13_i32 dim 1 : vector<1x16x256xf32>, i32 -> vector<1x16x256xf32>
    %c3_i32_26 = arith.constant 3 : i32
    %79 = vector.broadcast %c3_i32_26 : i32 to vector<1x16x1xi32>
    %80 = arith.addi %7, %79 : vector<1x16x1xi32>
    %c0_i32_27 = arith.constant 0 : i32
    %81 = vector.broadcast %c0_i32_27 : i32 to vector<1x16x1xi32>
    %82 = arith.cmpi sge, %80, %81 : vector<1x16x1xi32>
    %c3_i32_28 = arith.constant 3 : i32
    %83 = vector.broadcast %c3_i32_28 : i32 to vector<1x16x1xi32>
    %84 = arith.addi %7, %83 : vector<1x16x1xi32>
    %c16_i32_29 = arith.constant 16 : i32
    %85 = vector.broadcast %c16_i32_29 : i32 to vector<1x16x1xi32>
    %86 = arith.cmpi slt, %84, %85 : vector<1x16x1xi32>
    %87 = arith.andi %82, %86 : vector<1x16x1xi1>
    %cst_30 = arith.constant 0.000000e+00 : f32
    %88 = vector.shape_cast %87 : vector<1x16x1xi1> to vector<1x16x1xi1>
    %89 = vector.broadcast %88 : vector<1x16x1xi1> to vector<1x16x256xi1>
    %90 = vector.broadcast %cst_30 : f32 to vector<1x16x256xf32>
    %91 = arith.select %89, %78, %90 : vector<1x16x256xi1>, vector<1x16x256xf32>
    %92 = tpu.concatenate %21, %35, %49, %6, %63, %77, %91 in 2 : vector<1x16x256xf32>, vector<1x16x256xf32>, vector<1x16x256xf32>, vector<1x16x256xf32>, vector<1x16x256xf32>, vector<1x16x256xf32>, vector<1x16x256xf32> -> vector<1x16x1792xf32>
    %93 = vector.shape_cast %92 : vector<1x16x1792xf32> to vector<16x1792xf32>
    %c0_31 = arith.constant 0 : index
    %c0_32 = arith.constant 0 : index
    %94 = vector.load %arg2[%c0_31, %c0_32] : memref<1792x128xf32, #tpu.memory_space<vmem>>, vector<1792x128xf32>
    %cst_33 = arith.constant dense<0.000000e+00> : vector<16x128xf32>
    %95 = tpu.matmul %93, %94, %cst_33 {dimension_numbers = #tpu.dot_dimension_numbers<[1], [0], [0], [1], [0, 0, 1, 1], [], []>} : vector<16x1792xf32>, vector<1792x128xf32>, vector<16x128xf32> -> vector<16x128xf32>
    %c0_34 = arith.constant 0 : index
    %96 = memref.load %arg3[%c0_34] : memref<1xf32, #tpu.memory_space<smem>>
    %97 = vector.broadcast %96 : f32 to vector<16x128xf32>
    %98 = arith.addf %95, %97 : vector<16x128xf32>
    %99 = arith.negf %98 : vector<16x128xf32>
    %100 = math.exp %99 : vector<16x128xf32>
    %cst_35 = arith.constant 1.000000e+00 : f32
    %101 = vector.broadcast %cst_35 : f32 to vector<16x128xf32>
    %102 = arith.addf %101, %100 : vector<16x128xf32>
    %103 = arith.divf %101, %102 : vector<16x128xf32>
    %104 = vector.shape_cast %103 : vector<16x128xf32> to vector<1x1x16x128xf32>
    %c0_36 = arith.constant 0 : index
    %c0_37 = arith.constant 0 : index
    %c0_38 = arith.constant 0 : index
    %c0_39 = arith.constant 0 : index
    %105 = vector.load %arg4[%c0_36, %c0_37, %c0_38, %c0_39] : memref<1x1x16x128xf32, #tpu.memory_space<vmem>>, vector<1x1x16x128xf32>
    tpu.vector_store %arg4[%c0_36, %c0_37, %c0_38, %c0_39], %104 {strides = array<i32>} : memref<1x1x16x128xf32, #tpu.memory_space<vmem>>, vector<1x1x16x128xf32>,
    return
  }
  func.func @transform_0(%arg0: i32) -> (i32, i32, i32, i32) {
    %c0_i32 = arith.constant 0 : i32
    %c0_i32_0 = arith.constant 0 : i32
    %c0_i32_1 = arith.constant 0 : i32
    %c0_i32_2 = arith.constant 0 : i32
    return %arg0, %c0_i32, %c0_i32_0, %c0_i32_1 : i32, i32, i32, i32
  }
  func.func @transform_1(%arg0: i32) -> (i32, i32) {
    %c0_i32 = arith.constant 0 : i32
    %c0_i32_0 = arith.constant 0 : i32
    %c0_i32_1 = arith.constant 0 : i32
    return %c0_i32, %c0_i32_0 : i32, i32
  }
  func.func @transform_2(%arg0: i32) -> i32 {
    %c0_i32 = arith.constant 0 : i32
    %c0_i32_0 = arith.constant 0 : i32
    return %c0_i32 : i32
  }
  func.func @transform_3(%arg0: i32) -> (i32, i32, i32, i32) {
    %c0_i32 = arith.constant 0 : i32
    %c0_i32_0 = arith.constant 0 : i32
    %c0_i32_1 = arith.constant 0 : i32
    %c0_i32_2 = arith.constant 0 : i32
    return %arg0, %c0_i32, %c0_i32_0, %c0_i32_1 : i32, i32, i32, i32
  }
}

</mosaic_0001>

<bundles_post_ra>
// kernel: tpu_custom_call.1
= control target key start
LH: loop header
LB: loop body
LE: loop exit
PB: predicated region body
PF: predicated region fallthrough
CT: control target
= control target key end

     0   :  { %s2482_s0 = inlined_call_operand.hbm [shape: f32[2,4,16,16], index: 0, kind: input, shape index: {}]   ;;  %s2483_s1 = inlined_call_operand.hbm [shape: f32[1792,128], index: 1, kind: input, shape index: {}]   ;;  %s2484_s2 = inlined_call_operand.<no memory space> [shape: f32[1], index: 2, kind: input, shape index: {}]   ;;  %s2485_s3 = inlined_call_operand.hbm [shape: f32[2,1,16,128], index: 3, kind: output, shape index: {}]  }
   0x1   :  { %8 = sst [smem:[#allocation2]] %s2484_s2 }
   0x2   :  { %9 = vsyncpa [#allocation4], 0 }
   0x3   :  { %11 = vsyncpa [#allocation4 + $0x1], 0 }
   0x4   :  { %12 = vsyncpa [#allocation7], 0 }
   0x5   :  { %13 = vsyncpa [#allocation5], 0 }
   0x6   :  { %15 = vsyncpa [#allocation5 + $0x1], 0  ;;  %s2034_s14 = smov 0   ;;  %s2036_s15 = smov 0  }
   0x7   :  { %s2038_s16 = smov 0   ;;  %s2040_s17 = smov 0  }
   0x8 LB: > { %s2055_s2 = sadd.s32 4294967295, %s2002_s17   ;;  %s1263_s18 = sadd.s32 4294967294, %s2002_s17   ;;  %s2002_s17 = sphi %s2040_s17, %s2505_s17   ;;  %s1998_s16 = sphi %s2038_s16, %s2504_s16   ;;  %s1994_s15 = sphi %s2036_s15, %s2503_s15   ;;  %s1990_s14 = sphi %s2034_s14, %s2502_s14  }
   0x9   : > { %p41_p0 = scmp.ne.s32.totalorder %s1994_s15, %s1990_s14  ;;  %p2486_p1 = scmp.eq.s32.totalorder %s2055_s2, 0 }
   0xa   : > { %p113_p3 = scmp.eq.s32.totalorder %s1263_s18, 1  ;;  %p1264_p5 = scmp.ge.s32.totalorder %s2002_s17, 1 }
   0xb   : > { %p2064_p4 = por %p2486_p1, %p41_p0  ;;  %p120_p7 = scmp.lt.s32.totalorder %s2002_s17, 3 }
   0xc   : > { %p2069_p6 = por %p113_p3, %p41_p0  ;;  %s2004_s22 = smov [#allocation6]  }
   0xd   : > { %s2489_s19 = scalar_select %p2064_p4, 1, 0 }
   0xe   : > { %s2490_s20 = scalar_select %p2069_p6, 1, 0 }
   0xf   : > { %p2074_p8 = pnand %p1264_p5, %p120_p7  ;;  %s132_s23 = sshll.u32 %s2004_s22, 4  ;;  %s2078_s23 = int_to_ptr.vmem [resolvable:$true] %s132_s23 }
  0x10   : > { %s2090_s25 = sadd.s32 1, %s2002_s17   ;;  %s28_s26 = sadd.s32 1, %s1998_s16 }
  0x11   : > { %s2491_s21 = scalar_select %p2074_p8, 1, 0 }
  0x12   : > { %p1813_p9 = pneg %p2074_p8  ;;  %s25_s27 = ssub.s32 %s2002_s17, %s2090_s25 }
  0x13   : > { %s1874_s30 = scalar_lea.hbm %s2483_s1, 28672 }
  0x14   : > { %p2085_p11 = pnand %p1813_p9, %p2486_p1  ;;  %p1875_p12 = scmp.ne.s32.totalorder %s2483_s1, %s1874_s30 }
  0x15   : > { %p1881_p5 = scmp.lt.u32.totalorder %s1874_s30, %s2483_s1 }
  0x16   : > { %p1876_p13 = pneg %p2085_p11 }
  0x18   : > { %p1877_p0 = pnand %p1876_p13, %p1875_p12 }
  0x1a   : > { %p1878_p3 = pneg %p1877_p0 }
  0x1c   : > { %p1883_p7 = pnand %p1881_p5, %p1878_p3 }
  0x1e   : > { %1886 = shalt.err (!%p1883_p7)
}
  0x1f   : > { %s1887_s8 = scalar_lea.vmem %s2078_s23, 28672  ;;  %p1895_p2 = scmp.lt.s32.totalorder %s2078_s23, %s2078_s23 }
  0x20   : > { %p1888_p9 = scmp.ne.s32.totalorder %s2078_s23, %s1887_s8  ;;  %p1896_p6 = scmp.lt.s32.totalorder %s1887_s8, %s1887_s8 }
  0x22   : > { %p1890_p10 = pnand %p1888_p9, %p1876_p13  ;;  %p1897_p4 = por %p1896_p6, %p1895_p2 }
  0x24   : > { %p1891_p1 = pneg %p1890_p10 }
  0x26   : > { %p1898_p8 = pnand %p1897_p4, %p1891_p1 }
  0x28   : > { %1901 = shalt.err (!%p1898_p8)
}
  0x29   : > { %s2005_s9 = smov 128   ;;  %s2006_s10 = smov 8  }
  0x2a   : > { %1816 = dma.hbm_to_vmem [thread:$0]  (!%p2085_p11), %s2483_s1, 28672, %s2078_s23, [#allocation7], %s2005_s9, %s2005_s9, %s2006_s10  }
  0x2b   : > { %p26_p1 = scmp.eq.s32.totalorder %s25_s27, 0  ;;  %p35_p2 = scmp.ne.s32.totalorder %s1998_s16, %s1994_s15 }
  0x2c   : > { %p36_p4 = scmp.eq.s32.totalorder %s2002_s17, 0  ;;  %p1826_p6 = scmp.lt.s32.totalorder %s2002_s17, 2 }
  0x2d   : > { %s2124_s13 = scalar_select %p26_p1, %s1998_s16, %s28_s26  }
  0x2e   : > { %p37_p8 = por %p36_p4, %p35_p2  ;;  %p2493_p10 = scmp.eq.s32.totalorder %s2055_s2, 1 }
  0x2f   : > { %s149_s22 = sand.u32 1, %s1998_s16   ;;  %s1297_s24 = sshll.u32 %s2002_s17, 10 }
  0x30   : > { %p2128_p12 = por %p2493_p10, %p35_p2  ;;  %s1267_s28 = sshll.u32 %s149_s22, 6 }
  0x31   : > { %s2137_s4 = scalar_lea.hbm %s2482_s0, %s1297_s24  ;;  %s153_s23 = scalar_lea.vmem [#allocation3], %s1267_s28 }
  0x32   : > { %s160_s26 = sshll.u32 %s153_s23, 4  ;;  %p2139_p11 = pnand %p1826_p6, %p37_p8  ;;  %s2143_s26 = int_to_ptr.vmem [resolvable:$true] %s160_s26 }
  0x33   : > { %s2145_s5 = scalar_lea.sflag [#allocation4], %s149_s22  ;;  %s1902_s6 = scalar_lea.hbm %s2137_s4, 1024 }
  0x34   : > { %p1903_p13 = scmp.ne.s32.totalorder %s2137_s4, %s1902_s6  ;;  %p1904_p0 = pneg %p2139_p11 }
  0x35   : > { %s1907_s11 = scalar_lea.hbm %s2482_s0, 2048  ;;  %p1908_p7 = scmp.lt.u32.totalorder %s2137_s4, %s2482_s0 }
  0x36   : > { %p1905_p3 = pnand %p1904_p0, %p1903_p13  ;;  %p1909_p9 = scmp.lt.u32.totalorder %s1907_s11, %s1902_s6 }
  0x37   : > { %p1911_p2 = scmp.lt.u32.totalorder %s1902_s6, %s2137_s4 }
  0x38   : > { %p1906_p5 = pneg %p1905_p3  ;;  %p1910_p1 = por %p1909_p9, %p1908_p7 }
  0x3a   : > { %p1912_p4 = por %p1911_p2, %p1910_p1 }
  0x3c   : > { %p1913_p6 = pnand %p1912_p4, %p1906_p5 }
  0x3e   : > { %1916 = shalt.err (!%p1913_p6)
}
  0x3f   : > { %s1917_s22 = scalar_lea.vmem %s2143_s26, 1024  ;;  %s2007_s28 = smov [#allocation3]  }
  0x40   : > { %p1918_p8 = scmp.ne.s32.totalorder %s2143_s26, %s1917_s22  ;;  %s1922_s29 = sshll.u32 %s2007_s28, 4  ;;  %s1923_s29 = int_to_ptr.vmem [resolvable:$false] %s1922_s29 }
  0x41   : > { %s1924_s30 = scalar_lea.vmem %s1923_s29, 2048  ;;  %p1925_p3 = scmp.lt.s32.totalorder %s2143_s26, %s1923_s29 }
  0x42   : > { %p1920_p10 = pnand %p1918_p8, %p1904_p0  ;;  %p1926_p7 = scmp.lt.s32.totalorder %s1924_s30, %s1917_s22 }
  0x44   : > { %p1921_p13 = pneg %p1920_p10  ;;  %p1927_p9 = por %p1926_p7, %p1925_p3 }
  0x46   : > { %p1928_p1 = pnand %p1927_p9, %p1921_p13 }
  0x48   : > { %1931 = shalt.err (!%p1928_p1)
}
  0x49   : > { %1820 = dma.hbm_to_vmem [thread:$0]  (!%p2139_p11), %s2137_s4, 1024, %s2143_s26, %s2145_s5, %s2005_s9, %s2005_s9, %s2006_s10  }
  0x4a   : > { %p2496_p0 = scmp.ne.s32.totalorder %s2491_s21, 0 }
  0x4b   : > { %s2179_s23 = sand.u32 (!%p2496_p0), 1, %s1994_s15   ;;  %p2497_p5 = scmp.ne.s32.totalorder (!%p2496_p0), %s2489_s19, 0 }
  0x4c   : > { %172 = sbr.rel (%p2496_p0) target bundleno = 481 (0x1e1), region = 32  ;;  %s1271_s6 = sshll.u32 (!%p2496_p0), %s2179_s23, 6 }
  0x4d   : > { %s175_s7 = scalar_lea.sflag (!%p2496_p0), [#allocation4], %s2179_s23  ;;  %s2183_s8 = scalar_lea.vmem (!%p2496_p0), [#allocation3], %s1271_s6 }
  0x53   : > { %1977 = dma.done.wait (%p2497_p5), %s175_s7, 1024  }
  0x54   : > { %1979 = vsyncadd (%p2497_p5), %s175_s7, 4294966272  ;;  %p2498_p11 = scmp.eq.s32.totalorder %s2055_s2, 0 }
  0x56   : > { %1981 = dma.done.wait (%p2498_p11), [#allocation7], 28672   ;;  %p2499_p2 = pmov %p2498_p11 }
  0x57   : > { %v417_v0 = vld [vmem:[#allocation6 + $0x80] sm:$0xff]  ;;  %v418_v1 = vld [vmem:[#allocation6 + $0x88] sm:$0xff]  ;;  %v419_v11 = vld [vmem:[#allocation6 + $0x90] sm:$0xff]  ;;  %vm213_vm0 = vcmask 130048   ;;  %s625_s19 = sld [smem:[#allocation2]]  ;;  %s1273_s21 = sshll.u32 %s2179_s23, 4 }
  0x58   : > { %1983 = vsyncadd (%p2499_p2), [#allocation7], 4294938624  ;;  %v449_v2 = vld [vmem:[#allocation6 + $0x180] sm:$0xff]  ;;  %v1565_v3 = vpack.c.bf16 %v418_v1, %v417_v0  ;;  %v450_v4 = vld [vmem:[#allocation6 + $0x188] sm:$0xff]  ;;  %s1298_s9 = sshll.u32 %s2055_s2, 8  ;;  %s204_s10 = scalar_lea.vmem [#allocation8], %s1273_s21 }
  0x59   : > { %v401_v5 = vld [vmem:[#allocation6] sm:$0xff]  ;;  %v402_v6 = vld [vmem:[#allocation6 + $0x8] sm:$0xff]  ;;  %v1597_v7 = vpack.c.bf16 %v450_v4, %v449_v2  ;;  %v420_v13 = vld [vmem:[#allocation6 + $0x98] sm:$0xff]  ;;  %s1180_s4 = sshll.u32 %s204_s10, 4  ;;  %s2436_s5 = scalar_lea.hbm %s2485_s3, %s1298_s9  ;;  %s2438_s4 = int_to_ptr.vmem [resolvable:$true] %s1180_s4 }
  0x5a   : > { %v1567_v8 = vpack.c.bf16 %v402_v6, %v401_v5  ;;  %v433_v9 = vld [vmem:[#allocation6 + $0x100] sm:$0xff]  ;;  %v434_v10 = vld [vmem:[#allocation6 + $0x108] sm:$0xff]  ;;  %1566 = vmatprep.subr.bf16.mxu0 %v1565_v3  ;;  %v451_v14 = vld [vmem:[#allocation6 + $0x190] sm:$0xff]  ;;  %v1569_v16 = vpack.c.bf16 %v420_v13, %v419_v11  ;;  %v248_v11 = vlaneseq  ;;  %s1167_s11 = scalar_lea.sflag [#allocation5], %s2179_s23  ;;  %s1932_s12 = scalar_lea.vmem %s2438_s4, 256 }
  0x5b   : > { %v1599_v12 = vpack.c.bf16 %v434_v10, %v433_v9  ;;  %v452_v15 = vld [vmem:[#allocation6 + $0x198] sm:$0xff]  ;;  %1598 = vmatprep.subr.bf16.mxu1 %v1597_v7  ;;  %v403_v18 = vld [vmem:[#allocation6 + $0x10] sm:$0xff]  ;;  %v421_v23 = vld [vmem:[#allocation6 + $0xa0] sm:$0xff]  ;;  %p1933_p4 = scmp.ne.s32.totalorder %s2438_s4, %s1932_s12  ;;  %s2008_s2 = smov [#allocation8]  }
  0x5c   : > { %1568 = vmatpush3.bf16.msra.mxu0 %v1567_v8  ;;  %v1601_v17 = vpack.c.bf16 %v452_v15, %v451_v14  ;;  %v404_v19 = vld [vmem:[#allocation6 + $0x18] sm:$0xff]  ;;  %v435_v20 = vld [vmem:[#allocation6 + $0x110] sm:$0xff]  ;;  %v422_v24 = vld [vmem:[#allocation6 + $0xa8] sm:$0xff]  ;;  %s1936_s24 = sshll.u32 %s2008_s2, 4  ;;  %s1937_s24 = int_to_ptr.vmem [resolvable:$false] %s1936_s24 }
  0x5d   : > { %1600 = vmatpush3.bf16.msra.mxu1 %v1599_v12  ;;  %v1571_v21 = vpack.c.bf16 %v404_v19, %v403_v18  ;;  %v436_v22 = vld [vmem:[#allocation6 + $0x118] sm:$0xff]  ;;  %1570 = vmatprep.subr.bf16.mxu0 %v1569_v16  ;;  %v1573_v26 = vpack.c.bf16 %v422_v24, %v421_v23  ;;  %v453_v27 = vld [vmem:[#allocation6 + $0x1a0] sm:$0xff]  ;;  %v454_v28 = vld [vmem:[#allocation6 + $0x1a8] sm:$0xff]  ;;  %p1934_p6 = pnand %p1933_p4, %p2128_p12  ;;  %s1938_s22 = scalar_lea.vmem %s1937_s24, 512 }
  0x5e   : > { %1602 = vmatprep.subr.bf16.mxu1 %v1601_v17  ;;  %v1603_v25 = vpack.c.bf16 %v436_v22, %v435_v20  ;;  %v405_v29 = vld [vmem:[#allocation6 + $0x20] sm:$0xff]  ;;  %v1605_v30 = vpack.c.bf16 %v454_v28, %v453_v27  ;;  %v406_v31 = vld [vmem:[#allocation6 + $0x28] sm:$0xff]  ;;  %v423_v35 = vld [vmem:[#allocation6 + $0xb0] sm:$0xff]  ;;  %p1939_p10 = scmp.lt.s32.totalorder %s2438_s4, %s1937_s24  ;;  %p1940_p13 = scmp.lt.s32.totalorder %s1938_s22, %s1932_s12 }
  0x5f   : > { %v437_v32 = vld [vmem:[#allocation6 + $0x120] sm:$0xff]  ;;  %v438_v33 = vld [vmem:[#allocation6 + $0x128] sm:$0xff]  ;;  %v1575_v34 = vpack.c.bf16 %v406_v31, %v405_v29  ;;  %v424_v36 = vld [vmem:[#allocation6 + $0xb8] sm:$0xff]  ;;  %v2219_v29 = vshrl.u32 %v248_v11, 7  ;;  %p1935_p8 = pneg %p1934_p6 }
  0x60   : > { %1572 = vmatpush3.bf16.msra.mxu0 %v1571_v21  ;;  %v455_v37 = vld [vmem:[#allocation6 + $0x1b0] sm:$0xff]  ;;  %v1607_v38 = vpack.c.bf16 %v438_v33, %v437_v32  ;;  %v1577_v39 = vpack.c.bf16 %v424_v36, %v423_v35  ;;  %v456_v40 = vld [vmem:[#allocation6 + $0x1b8] sm:$0xff]  ;;  %v425_v46 = vld [vmem:[#allocation6 + $0xc0] sm:$0xff]  ;;  %p1941_p3 = por %p1940_p13, %p1939_p10 }
  0x61   : > { %1604 = vmatpush3.bf16.msra.mxu1 %v1603_v25  ;;  %1574 = vmatprep.subr.bf16.mxu0 %v1573_v26  ;;  %v407_v41 = vld [vmem:[#allocation6 + $0x30] sm:$0xff]  ;;  %v408_v42 = vld [vmem:[#allocation6 + $0x38] sm:$0xff]  ;;  %v1609_v43 = vpack.c.bf16 %v456_v40, %v455_v37  ;;  %v426_v47 = vld [vmem:[#allocation6 + $0xc8] sm:$0xff]  ;;  %vm255_vm1 = vcmp.lt.s32.totalorder %v2219_v29, 3  ;;  %vm280_vm2 = vcmp.lt.s32.totalorder %v2219_v29, 2  ;;  %vm305_vm5 = vcmp.lt.s32.totalorder %v2219_v29, 1 }
  0x62   : > { %1606 = vmatprep.subr.bf16.mxu1 %v1605_v30  ;;  %v439_v44 = vld [vmem:[#allocation6 + $0x130] sm:$0xff]  ;;  %v440_v45 = vld [vmem:[#allocation6 + $0x138] sm:$0xff]  ;;  %v457_v48 = vld [vmem:[#allocation6 + $0x1c0] sm:$0xff]  ;;  %v1579_v50 = vpack.c.bf16 %v408_v42, %v407_v41  ;;  %v1581_v54 = vpack.c.bf16 %v426_v47, %v425_v46  ;;  %vm330_vm7 = vcmp.lt.s32.totalorder %v2219_v29, 7  ;;  %vm355_vm8 = vcmp.lt.s32.totalorder %v2219_v29, 6  ;;  %p1942_p7 = pnand %p1941_p3, %p1935_p8 }
  0x63   : > { %v458_v49 = vld [vmem:[#allocation6 + $0x1c8] sm:$0xff]  ;;  %v409_v51 = vld [vmem:[#allocation6 + $0x40] sm:$0xff]  ;;  %v1611_v53 = vpack.c.bf16 %v440_v45, %v439_v44  ;;  %v427_v57 = vld [vmem:[#allocation6 + $0xd0] sm:$0xff]  ;;  %vm380_vm9 = vcmp.lt.s32.totalorder %v2219_v29, 5 }
  0x64   : > { %1576 = vmatpush3.bf16.msra.mxu0 %v1575_v34  ;;  %v410_v52 = vld [vmem:[#allocation6 + $0x48] sm:$0xff]  ;;  %v441_v55 = vld [vmem:[#allocation6 + $0x140] sm:$0xff]  ;;  %v1613_v58 = vpack.c.bf16 %v458_v49, %v457_v48  ;;  %v428_v59 = vld [vmem:[#allocation6 + $0xd8] sm:$0xff] }
  0x65   : > { %1608 = vmatpush3.bf16.msra.mxu1 %v1607_v38  ;;  %1578 = vmatprep.subr.bf16.mxu0 %v1577_v39  ;;  %v442_v56 = vld [vmem:[#allocation6 + $0x148] sm:$0xff]  ;;  %v459_v60 = vld [vmem:[#allocation6 + $0x1d0] sm:$0xff]  ;;  %v460_v61 = vld [vmem:[#allocation6 + $0x1d8] sm:$0xff]  ;;  %v1583_v2 = vpack.c.bf16 %v410_v52, %v409_v51  ;;  %v1585_v7 = vpack.c.bf16 %v428_v59, %v427_v57 }
  0x66   : > { %1610 = vmatprep.subr.bf16.mxu1 %v1609_v43  ;;  %v411_v62 = vld [vmem:[#allocation6 + $0x50] sm:$0xff]  ;;  %v412_v63 = vld [vmem:[#allocation6 + $0x58] sm:$0xff]  ;;  %v429_v3 = vld [vmem:[#allocation6 + $0xe0] sm:$0xff]  ;;  %v1615_v6 = vpack.c.bf16 %v442_v56, %v441_v55  ;;  %v1617_v12 = vpack.c.bf16 %v460_v61, %v459_v60 }
  0x67   : > { %v443_v0 = vld [vmem:[#allocation6 + $0x150] sm:$0xff]  ;;  %v444_v1 = vld [vmem:[#allocation6 + $0x158] sm:$0xff]  ;;  %v430_v4 = vld [vmem:[#allocation6 + $0xe8] sm:$0xff]  ;;  %v1587_v19 = vpack.c.bf16 %v412_v63, %v411_v62 }
  0x68   : > { %1580 = vmatpush3.bf16.msra.mxu0 %v1579_v50  ;;  %v461_v5 = vld [vmem:[#allocation6 + $0x1e0] sm:$0xff]  ;;  %v462_v8 = vld [vmem:[#allocation6 + $0x1e8] sm:$0xff]  ;;  %v2201_v15 = vld [vmem:[#allocation6 + $0xf0] sm:$0xff]  ;;  %v1619_v20 = vpack.c.bf16 %v444_v1, %v443_v0  ;;  %v1589_v21 = vpack.c.bf16 %v430_v4, %v429_v3 }
  0x69   : > { %1612 = vmatpush3.bf16.msra.mxu1 %v1611_v53  ;;  %1582 = vmatprep.subr.bf16.mxu0 %v1581_v54  ;;  %v2193_v9 = vld [vmem:[#allocation6 + $0x60] sm:$0xff]  ;;  %v2195_v10 = vld [vmem:[#allocation6 + $0x68] sm:$0xff]  ;;  %v2203_v16 = vld [vmem:[#allocation6 + $0xf8] sm:$0xff]  ;;  %v1621_v24 = vpack.c.bf16 %v462_v8, %v461_v5 }
  0x6a   : > { %1614 = vmatprep.subr.bf16.mxu1 %v1613_v58  ;;  %v2197_v13 = vld [vmem:[#allocation6 + $0x160] sm:$0xff]  ;;  %v2199_v14 = vld [vmem:[#allocation6 + $0x168] sm:$0xff]  ;;  %v2205_v17 = vld [vmem:[#allocation6 + $0x1f0] sm:$0xff]  ;;  %v1591_v25 = vpack.c.bf16 %v2195_v10, %v2193_v9  ;;  %v1593_v30 = vpack.c.bf16 %v2203_v16, %v2201_v15  ;;  %v285_v15 = vadd.s32 4294967294, %v2219_v29 }
  0x6b   : > { %v2207_v18 = vld [vmem:[#allocation6 + $0x1f8] sm:$0xff]  ;;  %v2209_v22 = vld [vmem:[#allocation6 + $0x70] sm:$0xff]  ;;  %v1623_v26 = vpack.c.bf16 %v2199_v14, %v2197_v13  ;;  %v205_v27 = vld [vmem:[%s2183_s8] sm:$0xff]  ;;  %v260_v13 = vadd.s32 4294967293, %v2219_v29 }
  0x6c   : > { %1584 = vmatpush3.bf16.msra.mxu0 %v1583_v2  ;;  %v2211_v23 = vld [vmem:[#allocation6 + $0x78] sm:$0xff]  ;;  %v206_v28 = vld [vmem:[%s2183_s8 + $0x8] sm:$0xff]  ;;  %v1625_v31 = vpack.c.bf16 %v2207_v18, %v2205_v17  ;;  %v207_v32 = vld [vmem:[%s2183_s8 + $0x10] sm:$0xff]  ;;  %v228_v35 = vsel %vm213_vm0, %v205_v27, 0.0  ;;  %v214_v43 = vsel %vm213_vm0, %v205_v27, -inf  ;;  %vm287_vm4 = vcmp.ge.s32.totalorder %v285_v15, 0 }
  0x6d   : > { %1616 = vmatpush3.bf16.msra.mxu1 %v1615_v6  ;;  %1586 = vmatprep.subr.bf16.mxu0 %v1585_v7  ;;  %v208_v33 = vld [vmem:[%s2183_s8 + $0x18] sm:$0xff]  ;;  %v209_v34 = vld [vmem:[%s2183_s8 + $0x20] sm:$0xff]  ;;  %v235_v36 = vsel %vm213_vm0, %v206_v28, 0.0  ;;  %v1595_v37 = vpack.c.bf16 %v2211_v23, %v2209_v22  ;;  %v210_v38 = vld [vmem:[%s2183_s8 + $0x28] sm:$0xff]  ;;  %v215_v41 = vsel %vm213_vm0, %v207_v32, -inf  ;;  %v229_v48 = vsel %vm213_vm0, %v207_v32, 0.0 }
  0x6e   : > { %1618 = vmatprep.subr.bf16.mxu1 %v1617_v12  ;;  %v211_v39 = vld [vmem:[%s2183_s8 + $0x30] sm:$0xff]  ;;  %v212_v40 = vld [vmem:[%s2183_s8 + $0x38] sm:$0xff]  ;;  %v222_v42 = vsel %vm213_vm0, %v208_v33, -inf  ;;  %v216_v45 = vsel %vm213_vm0, %v209_v34, -inf  ;;  %v223_v51 = vsel %vm213_vm0, %v210_v38, -inf  ;;  %v230_v52 = vadd.f32 %v229_v48, %v228_v35  ;;  %v481_v54 = vld [vmem:[#allocation6 + $0x280] sm:$0xff] }
  0x6f   : > { %v447_v44 = vld [vmem:[#allocation6 + $0x170] sm:$0xff]  ;;  %v218_v46 = vsel %vm213_vm0, %v211_v39, -inf  ;;  %v225_v47 = vsel %vm213_vm0, %v212_v40, -inf  ;;  %v448_v49 = vld [vmem:[#allocation6 + $0x178] sm:$0xff]  ;;  %v231_v53 = vsel %vm213_vm0, %v209_v34, 0.0  ;;  %v482_v55 = vld [vmem:[#allocation6 + $0x288] sm:$0xff]  ;;  %v217_v62 = vmax.f32 %v214_v43, %v216_v45 }
  0x70   : > { %1588 = vmatpush3.bf16.msra.mxu0 %v1587_v19  ;;  %v219_v50 = vmax.f32 %v215_v41, %v218_v46  ;;  %v226_v56 = vmax.f32 %v222_v42, %v225_v47  ;;  %v233_v57 = vsel %vm213_vm0, %v211_v39, 0.0  ;;  %v236_v58 = vsel %vm213_vm0, %v208_v33, 0.0  ;;  %v513_v0 = vld [vmem:[#allocation6 + $0x380] sm:$0xff]  ;;  %v514_v1 = vld [vmem:[#allocation6 + $0x388] sm:$0xff]  ;;  %v484_v32 = vld [vmem:[#allocation6 + $0x298] sm:$0xff] }
  0x71   : > { %1620 = vmatpush3.bf16.msra.mxu1 %v1619_v20  ;;  %1590 = vmatprep.subr.bf16.mxu0 %v1589_v21  ;;  %v238_v59 = vsel %vm213_vm0, %v210_v38, 0.0  ;;  %v232_v60 = vadd.f32 %v231_v53, %v230_v52  ;;  %v237_v61 = vadd.f32 %v236_v58, %v235_v36  ;;  %v221_v63 = vsel %vm213_vm0, %v206_v28, -inf  ;;  %v465_v23 = vld [vmem:[#allocation6 + $0x200] sm:$0xff]  ;;  %v498_v28 = vld [vmem:[#allocation6 + $0x308] sm:$0xff]  ;;  %v515_v33 = vld [vmem:[#allocation6 + $0x390] sm:$0xff] }
  0x72   : > { %1622 = vmatprep.subr.bf16.mxu1 %v1621_v24  ;;  %v1627_v2 = vpack.c.bf16 %v448_v49, %v447_v44  ;;  %v240_v3 = vsel %vm213_vm0, %v212_v40, 0.0  ;;  %v224_v4 = vmax.f32 %v221_v63, %v223_v51  ;;  %v1629_v5 = vpack.c.bf16 %v482_v55, %v481_v54  ;;  %v466_v24 = vld [vmem:[#allocation6 + $0x208] sm:$0xff]  ;;  %v497_v27 = vld [vmem:[#allocation6 + $0x300] sm:$0xff]  ;;  %v516_v34 = vld [vmem:[#allocation6 + $0x398] sm:$0xff] }
  0x73   : > { %v234_v6 = vadd.f32 %v233_v57, %v232_v60  ;;  %v239_v7 = vadd.f32 %v238_v59, %v237_v61  ;;  %v2249_v8 = vmax.f32 %v217_v62, %v219_v50  ;;  %v1661_v10 = vpack.c.bf16 %v514_v1, %v513_v0  ;;  %v468_v38 = vld [vmem:[#allocation6 + $0x218] sm:$0xff]  ;;  %v499_v47 = vld [vmem:[#allocation6 + $0x310] sm:$0xff]  ;;  %v485_v49 = vld [vmem:[#allocation6 + $0x2a0] sm:$0xff] }
  0x74   : > { %1592 = vmatpush3.bf16.msra.mxu0 %v1591_v25  ;;  %v2252_v9 = vmax.f32 %v224_v4, %v226_v56  ;;  %vm262_vm3 = vcmp.ge.s32.totalorder %v260_v13, 0  ;;  %v1631_v41 = vpack.c.bf16 %v466_v24, %v465_v23  ;;  %v1663_v42 = vpack.c.bf16 %v498_v28, %v497_v27  ;;  %v500_v48 = vld [vmem:[#allocation6 + $0x318] sm:$0xff]  ;;  %v486_v51 = vld [vmem:[#allocation6 + $0x2a8] sm:$0xff]  ;;  %v517_v52 = vld [vmem:[#allocation6 + $0x3a0] sm:$0xff] }
  0x75   : > { %1624 = vmatpush3.bf16.msra.mxu1 %v1623_v26  ;;  %1594 = vmatprep.subr.bf16.mxu0 %v1593_v30  ;;  %v241_v11 = vadd.f32 %v240_v3, %v239_v7  ;;  %v2254_v12 = vmul.f32 0.25, %v234_v6  ;;  %v2259_v14 = vsel %vm213_vm0, %v2249_v8, 0.0  ;;  %v483_v30 = vld [vmem:[#allocation6 + $0x290] sm:$0xff]  ;;  %v1665_v46 = vpack.c.bf16 %v516_v34, %v515_v33  ;;  %v518_v53 = vld [vmem:[#allocation6 + $0x3a8] sm:$0xff]  ;;  %v469_v60 = vld [vmem:[#allocation6 + $0x220] sm:$0xff] }
  0x76   : > { %1626 = vmatprep.subr.bf16.mxu1 %v1625_v31  ;;  %v2264_v16 = vsel %vm213_vm0, %v2252_v9, 0.0  ;;  %v251_v17 = vrot.slane %v2259_v14, 5  ;;  %v276_v18 = vrot.slane %v2259_v14, 6  ;;  %v1633_v45 = vpack.c.bf16 %v484_v32, %v483_v30  ;;  %v470_v61 = vld [vmem:[#allocation6 + $0x228] sm:$0xff]  ;;  %v501_v62 = vld [vmem:[#allocation6 + $0x320] sm:$0xff]  ;;  %v487_v4 = vld [vmem:[#allocation6 + $0x2b0] sm:$0xff] }
  0x77   : > { %v2268_v19 = vmul.f32 0.25, %v241_v11  ;;  %v2272_v20 = vsel %vm213_vm0, %v2254_v12, 0.0  ;;  %v253_v21 = vrot.slane %v2264_v16, 5  ;;  %v278_v22 = vrot.slane %v2264_v16, 6  ;;  %v502_v3 = vld [vmem:[#allocation6 + $0x328] sm:$0xff]  ;;  %v519_v6 = vld [vmem:[#allocation6 + $0x3b0] sm:$0xff] }
  0x78   : > { %1596 = vmatpush3.bf16.msra.mxu0 %v1595_v37  ;;  %v252_v25 = vrot.slane %v2272_v20, 5  ;;  %v277_v26 = vrot.slane %v2272_v20, 6  ;;  %v467_v37 = vld [vmem:[#allocation6 + $0x210] sm:$0xff]  ;;  %v2296_v54 = vadd.s32 4294967295, %v2219_v29  ;;  %v302_v57 = vrot.slane %v2272_v20, 7  ;;  %v520_v7 = vld [vmem:[#allocation6 + $0x3b8] sm:$0xff] }
  0x79   : > { %1628 = vmatpush3.bf16.msra.mxu1 %v1627_v2  ;;  %1630 = vmatprep.subr.bf16.mxu0 %v1629_v5  ;;  %v2281_v31 = vsel %vm213_vm0, %v2268_v19, 0.0  ;;  %v258_v39 = vsel %vm255_vm1, %v253_v21, %v251_v17  ;;  %v283_v40 = vsel %vm280_vm2, %v278_v22, %v276_v18  ;;  %v1635_v50 = vpack.c.bf16 %v468_v38, %v467_v37  ;;  %v488_v5 = vld [vmem:[#allocation6 + $0x2b8] sm:$0xff]  ;;  %v489_v24 = vld [vmem:[#allocation6 + $0x2c0] sm:$0xff]  ;;  %v490_v28 = vld [vmem:[#allocation6 + $0x2c8] sm:$0xff] }
  0x7a   : > { %1662 = vmatprep.subr.bf16.mxu1 %v1661_v10  ;;  %v254_v35 = vrot.slane %v2281_v31, 5  ;;  %v279_v36 = vrot.slane %v2281_v31, 6  ;;  %v304_v58 = vrot.slane %v2281_v31, 7  ;;  %v1667_v59 = vpack.c.bf16 %v500_v48, %v499_v47  ;;  %v504_v23 = vld [vmem:[#allocation6 + $0x338] sm:$0xff]  ;;  %v521_v30 = vld [vmem:[#allocation6 + $0x3c0] sm:$0xff]  ;;  %v522_v32 = vld [vmem:[#allocation6 + $0x3c8] sm:$0xff] }
  0x7b   : > { %v256_v63 = vsel %vm255_vm1, %v251_v17, %v253_v21  ;;  %v281_v0 = vsel %vm280_vm2, %v276_v18, %v278_v22  ;;  %v1637_v1 = vpack.c.bf16 %v486_v51, %v485_v49  ;;  %v1669_v2 = vpack.c.bf16 %v518_v53, %v517_v52  ;;  %v471_v17 = vld [vmem:[#allocation6 + $0x230] sm:$0xff]  ;;  %v472_v18 = vld [vmem:[#allocation6 + $0x238] sm:$0xff]  ;;  %v473_v38 = vld [vmem:[#allocation6 + $0x240] sm:$0xff] }
  0x7c   : > { %v259_v43 = vsel %vm255_vm1, %v254_v35, %v252_v25  ;;  %v284_v44 = vsel %vm280_vm2, %v279_v36, %v277_v26  ;;  %v257_v55 = vsel %vm255_vm1, %v252_v25, %v254_v35  ;;  %v282_v56 = vsel %vm280_vm2, %v277_v26, %v279_v36  ;;  %v503_v22 = vld [vmem:[#allocation6 + $0x330] sm:$0xff]  ;;  %v492_v48 = vld [vmem:[#allocation6 + $0x2d8] sm:$0xff] }
  0x7d   : > { %1274 = vmatprep.mubr.msk.f32.mxu0 %vm262_vm3, %v259_v43  ;;  %1276 = vmatprep.mubr.msk.f32.mxu1 %vm287_vm4, %v284_v44  ;;  %v309_v10 = vsel %vm305_vm5, %v304_v58, %v302_v57  ;;  %vm312_vm6 = vcmp.ge.s32.totalorder %v2296_v54, 0  ;;  %v1639_v11 = vpack.c.bf16 %v470_v61, %v469_v60  ;;  %v1671_v13 = vpack.c.bf16 %v502_v3, %v501_v62  ;;  %v505_v43 = vld [vmem:[#allocation6 + $0x340] sm:$0xff]  ;;  %v506_v44 = vld [vmem:[#allocation6 + $0x348] sm:$0xff]  ;;  %v523_v49 = vld [vmem:[#allocation6 + $0x3d0] sm:$0xff] }
  0x7e   : > { %1275 = vmatmul.mubr.msk.f32.vlgmr.msra.gmra.mrb[0].mxu0 %vm262_vm3, %v258_v39  ;;  %1277 = vmatmul.mubr.msk.f32.vlgmr.msra.gmra.mrb[0].mxu1 %vm287_vm4, %v283_v40  ;;  %v1641_v15 = vpack.c.bf16 %v488_v5, %v487_v4  ;;  %v1673_v21 = vpack.c.bf16 %v520_v7, %v519_v6  ;;  %v326_v25 = vrot.slane %v2259_v14, 1  ;;  %v328_v26 = vrot.slane %v2264_v16, 1  ;;  %v474_v39 = vld [vmem:[#allocation6 + $0x248] sm:$0xff]  ;;  %v475_v60 = vld [vmem:[#allocation6 + $0x250] sm:$0xff]  ;;  %v476_v61 = vld [vmem:[#allocation6 + $0x258] sm:$0xff] }
  0x7f   : > { %1632 = vmatpush3.bf16.msra.mxu0 %v1631_v41  ;;  %1664 = vmatpush3.bf16.msra.mxu1 %v1663_v42  ;;  %v351_v27 = vrot.slane %v2259_v14, 2  ;;  %v353_v33 = vrot.slane %v2264_v16, 2  ;;  %v1643_v36 = vpack.c.bf16 %v472_v18, %v471_v17  ;;  %v1675_v37 = vpack.c.bf16 %v504_v23, %v503_v22  ;;  %v493_v3 = vld [vmem:[#allocation6 + $0x2e0] sm:$0xff]  ;;  %v494_v5 = vld [vmem:[#allocation6 + $0x2e8] sm:$0xff]  ;;  %v495_v23 = vld [vmem:[#allocation6 + $0x2f0] sm:$0xff] }
  0x80   : > { %1634 = vmatprep.subr.bf16.mxu0 %v1633_v45  ;;  %1666 = vmatprep.subr.bf16.mxu1 %v1665_v46  ;;  %v2330_v34 = vsel %vm330_vm7, %v326_v25, %v328_v26  ;;  %v2334_v35 = vsel %vm330_vm7, %v328_v26, %v326_v25  ;;  %v377_v40 = vrot.slane %v2272_v20, 3  ;;  %v1645_v41 = vpack.c.bf16 %v490_v28, %v489_v24  ;;  %v491_v45 = vld [vmem:[#allocation6 + $0x2d0] sm:$0xff]  ;;  %v525_v6 = vld [vmem:[#allocation6 + $0x3e0] sm:$0xff]  ;;  %v526_v7 = vld [vmem:[#allocation6 + $0x3e8] sm:$0xff] }
  0x81   : > { %696 = vmatprep.mubr.f32.mxu0 %v257_v55  ;;  %771 = vmatprep.mubr.f32.mxu1 %v282_v56  ;;  %v1677_v42 = vpack.c.bf16 %v522_v32, %v521_v30  ;;  %v2344_v46 = vsel %vm355_vm8, %v353_v33, %v351_v27  ;;  %v379_v47 = vrot.slane %v2281_v31, 3  ;;  %v376_v51 = vrot.slane %v2259_v14, 3  ;;  %v510_v22 = vld [vmem:[#allocation6 + $0x368] sm:$0xff]  ;;  %v496_v24 = vld [vmem:[#allocation6 + $0x2f8] sm:$0xff]  ;;  %v527_v25 = vld [vmem:[#allocation6 + $0x3f0] sm:$0xff] }
  0x82   : > { %697 = vmatmul.mubr.f32.gmra.mrb[2].mxu0 %v256_v63  ;;  %772 = vmatmul.mubr.f32.gmra.mrb[2].mxu1 %v281_v0  ;;  %v378_v52 = vrot.slane %v2264_v16, 3  ;;  %v1647_v56 = vpack.c.bf16 %v474_v39, %v473_v38  ;;  %v1649_v63 = vpack.c.bf16 %v492_v48, %v491_v45  ;;  %v1653_v17 = vpack.c.bf16 %v494_v5, %v493_v3  ;;  %v528_v26 = vld [vmem:[#allocation6 + $0x3f8] sm:$0xff]  ;;  %v479_v30 = vld [vmem:[#allocation6 + $0x270] sm:$0xff]  ;;  %v545_v39 = vld [vmem:[#allocation6 + $0x480] sm:$0xff] }
  0x83   : > { %1636 = vmatpush3.bf16.msra.mxu0 %v1635_v50  ;;  %1668 = vmatpush3.bf16.msra.mxu1 %v1667_v59  ;;  %v524_v50 = vld [vmem:[#allocation6 + $0x3d8] sm:$0xff]  ;;  %v2351_v53 = vsel %vm380_vm9, %v377_v40, %v379_v47  ;;  %v2355_v55 = vsel %vm380_vm9, %v379_v47, %v377_v40  ;;  %v1679_v59 = vpack.c.bf16 %v506_v44, %v505_v43  ;;  %v546_v40 = vld [vmem:[#allocation6 + $0x488] sm:$0xff]  ;;  %v301_v45 = vrot.slane %v2259_v14, 7  ;;  %v529_v48 = vld [vmem:[#allocation6 + $0x400] sm:$0xff] }
  0x84   : > { %1638 = vmatprep.subr.bf16.mxu0 %v1637_v1  ;;  %1670 = vmatprep.subr.bf16.mxu1 %v1669_v2  ;;  %v2359_v62 = vsel %vm380_vm9, %v376_v51, %v378_v52  ;;  %v1681_v0 = vpack.c.bf16 %v524_v50, %v523_v49  ;;  %v507_v1 = vld [vmem:[#allocation6 + $0x350] sm:$0xff]  ;;  %v508_v2 = vld [vmem:[#allocation6 + $0x358] sm:$0xff]  ;;  %v2363_v4 = vsel %vm380_vm9, %v378_v52, %v376_v51  ;;  %v303_v47 = vrot.slane %v2264_v16, 7  ;;  %v530_v51 = vld [vmem:[#allocation6 + $0x408] sm:$0xff] }
  0x85   : > { %1278 = vmatprep.mubr.msk.f32.mxu0 %vm312_vm6, %v309_v10  ;;  %1280 = vmatprep.mubr.msk.f32.mxu1 %vm213_vm0, %v2254_v12  ;;  %v2339_v12 = vsel %vm355_vm8, %v351_v27, %v353_v33  ;;  %v1651_v10 = vpack.c.bf16 %v476_v61, %v475_v60  ;;  %v1685_v18 = vpack.c.bf16 %v526_v7, %v525_v6  ;;  %v480_v32 = vld [vmem:[#allocation6 + $0x278] sm:$0xff]  ;;  %v561_v52 = vld [vmem:[#allocation6 + $0x500] sm:$0xff]  ;;  %v579_v61 = vld [vmem:[#allocation6 + $0x590] sm:$0xff] }
  0x86   : > { %v1657_v33 = vpack.c.bf16 %v496_v24, %v495_v23  ;;  %v512_v38 = vld [vmem:[#allocation6 + $0x378] sm:$0xff]  ;;  %v1659_v43 = vpack.c.bf16 %v480_v32, %v479_v30  ;;  %v1693_v49 = vpack.c.bf16 %v546_v40, %v545_v39  ;;  %v1695_v14 = vpack.c.bf16 %v530_v51, %v529_v48  ;;  %v531_v16 = vld [vmem:[#allocation6 + $0x410] sm:$0xff]  ;;  %v549_v7 = vld [vmem:[#allocation6 + $0x4a0] sm:$0xff] }
  0x87   : > { %1640 = vmatpush3.bf16.msra.mxu0 %v1639_v11  ;;  %1672 = vmatpush3.bf16.msra.mxu1 %v1671_v13  ;;  %v1683_v11 = vpack.c.bf16 %v508_v2, %v507_v1  ;;  %v477_v13 = vld [vmem:[#allocation6 + $0x260] sm:$0xff]  ;;  %v548_v60 = vld [vmem:[#allocation6 + $0x498] sm:$0xff]  ;;  %v563_v5 = vld [vmem:[#allocation6 + $0x510] sm:$0xff]  ;;  %v354_v23 = vrot.slane %v2281_v31, 2 }
  0x88   : > { %1642 = vmatprep.subr.bf16.mxu0 %v1641_v15  ;;  %1674 = vmatprep.subr.bf16.mxu1 %v1673_v21  ;;  %v478_v15 = vld [vmem:[#allocation6 + $0x268] sm:$0xff]  ;;  %v509_v21 = vld [vmem:[#allocation6 + $0x360] sm:$0xff]  ;;  %v532_v2 = vld [vmem:[#allocation6 + $0x418] sm:$0xff] }
  0x89   : > { %v1655_v27 = vpack.c.bf16 %v478_v15, %v477_v13  ;;  %v1687_v28 = vpack.c.bf16 %v510_v22, %v509_v21  ;;  %v564_v6 = vld [vmem:[#allocation6 + $0x518] sm:$0xff]  ;;  %v550_v13 = vld [vmem:[#allocation6 + $0x4a8] sm:$0xff]  ;;  %v581_v15 = vld [vmem:[#allocation6 + $0x5a0] sm:$0xff]  ;;  %v329_v21 = vrot.slane %v2281_v31, 1  ;;  %v352_v22 = vrot.slane %v2272_v20, 2 }
  0x8a   : > { %v1731_v24 = vpack.c.bf16 %v564_v6, %v563_v5  ;;  %v533_v54 = vld [vmem:[#allocation6 + $0x420] sm:$0xff]  ;;  %v551_v30 = vld [vmem:[#allocation6 + $0x4b0] sm:$0xff]  ;;  %v552_v32 = vld [vmem:[#allocation6 + $0x4b8] sm:$0xff] }
  0x8b   : > { %1644 = vmatpush3.bf16.msra.mxu0 %v1643_v36  ;;  %1676 = vmatpush3.bf16.msra.mxu1 %v1675_v37  ;;  %v1689_v36 = vpack.c.bf16 %v528_v26, %v527_v25  ;;  %v511_v37 = vld [vmem:[#allocation6 + $0x370] sm:$0xff]  ;;  %v534_v25 = vld [vmem:[#allocation6 + $0x428] sm:$0xff]  ;;  %v585_v48 = vld [vmem:[#allocation6 + $0x5c0] sm:$0xff] }
  0x8c   : > { %1646 = vmatprep.subr.bf16.mxu0 %v1645_v41  ;;  %1678 = vmatprep.subr.bf16.mxu1 %v1677_v42  ;;  %v577_v41 = vld [vmem:[#allocation6 + $0x580] sm:$0xff]  ;;  %v578_v42 = vld [vmem:[#allocation6 + $0x588] sm:$0xff]  ;;  %v1691_v44 = vpack.c.bf16 %v512_v38, %v511_v37  ;;  %v1703_v38 = vpack.c.bf16 %v534_v25, %v533_v54  ;;  %v535_v40 = vld [vmem:[#allocation6 + $0x430] sm:$0xff] }
  0x8d   : > { %v1725_v50 = vpack.c.bf16 %v578_v42, %v577_v41  ;;  %v1705_v41 = vpack.c.bf16 %v552_v32, %v551_v30  ;;  %v539_v5 = vld [vmem:[#allocation6 + $0x450] sm:$0xff]  ;;  %v540_v6 = vld [vmem:[#allocation6 + $0x458] sm:$0xff]  ;;  %v541_v25 = vld [vmem:[#allocation6 + $0x460] sm:$0xff] }
  0x8e   : > { %v574_v30 = vld [vmem:[#allocation6 + $0x568] sm:$0xff]  ;;  %v559_v32 = vld [vmem:[#allocation6 + $0x4f0] sm:$0xff] }
  0x8f   : > { %1648 = vmatpush3.bf16.msra.mxu0 %v1647_v56  ;;  %1680 = vmatpush3.bf16.msra.mxu1 %v1679_v59  ;;  %v562_v56 = vld [vmem:[#allocation6 + $0x508] sm:$0xff]  ;;  %v547_v59 = vld [vmem:[#allocation6 + $0x490] sm:$0xff] }
  0x90   : > { %1650 = vmatprep.subr.bf16.mxu0 %v1649_v63  ;;  %1682 = vmatprep.subr.bf16.mxu1 %v1681_v0  ;;  %v580_v63 = vld [vmem:[#allocation6 + $0x598] sm:$0xff]  ;;  %v308_v0 = vsel %vm305_vm5, %v303_v47, %v301_v45  ;;  %v1727_v1 = vpack.c.bf16 %v562_v56, %v561_v52  ;;  %v1697_v3 = vpack.c.bf16 %v548_v60, %v547_v59  ;;  %v537_v52 = vld [vmem:[#allocation6 + $0x440] sm:$0xff]  ;;  %v538_v56 = vld [vmem:[#allocation6 + $0x448] sm:$0xff] }
  0x93   : > { %1652 = vmatpush3.bf16.msra.mxu0 %v1651_v10  ;;  %1684 = vmatpush3.bf16.msra.mxu1 %v1683_v11  ;;  %v307_v10 = vsel %vm305_vm5, %v302_v57, %v304_v58  ;;  %v1729_v11 = vpack.c.bf16 %v580_v63, %v579_v61  ;;  %v306_v57 = vsel %vm305_vm5, %v301_v45, %v303_v47  ;;  %v553_v45 = vld [vmem:[#allocation6 + $0x4c0] sm:$0xff]  ;;  %v554_v47 = vld [vmem:[#allocation6 + $0x4c8] sm:$0xff] }
  0x94   : > { %1654 = vmatprep.subr.bf16.mxu0 %v1653_v17  ;;  %1686 = vmatprep.subr.bf16.mxu1 %v1685_v18  ;;  %v582_v17 = vld [vmem:[#allocation6 + $0x5a8] sm:$0xff]  ;;  %v327_v18 = vrot.slane %v2272_v20, 1  ;;  %v1699_v58 = vpack.c.bf16 %v532_v2, %v531_v16  ;;  %v1709_v59 = vpack.c.bf16 %v554_v47, %v553_v45  ;;  %v569_v61 = vld [vmem:[#allocation6 + $0x540] sm:$0xff]  ;;  %v588_v16 = vld [vmem:[#allocation6 + $0x5d8] sm:$0xff]  ;;  %v1711_v2 = vpack.c.bf16 %v538_v56, %v537_v52 }
  0x95   : > { %v1733_v26 = vpack.c.bf16 %v582_v17, %v581_v15  ;;  %v570_v63 = vld [vmem:[#allocation6 + $0x548] sm:$0xff]  ;;  %v557_v15 = vld [vmem:[#allocation6 + $0x4e0] sm:$0xff]  ;;  %v250_v47 = vadd.s32 8, %v2219_v29  ;;  %v615_v20 = vld [vmem:[#allocation6 + $0x6b0] sm:$0xff] }
  0x96   : > { %v332_v37 = vsel %vm330_vm7, %v327_v18, %v329_v21  ;;  %v558_v17 = vld [vmem:[#allocation6 + $0x4e8] sm:$0xff] }
  0x97   : > { %1656 = vmatpush3.bf16.msra.mxu0 %v1655_v27  ;;  %1688 = vmatpush3.bf16.msra.mxu1 %v1687_v28  ;;  %v565_v27 = vld [vmem:[#allocation6 + $0x520] sm:$0xff]  ;;  %v566_v28 = vld [vmem:[#allocation6 + $0x528] sm:$0xff]  ;;  %v336_v56 = vadd.s32 1, %v250_v47 }
  0x98   : > { %1658 = vmatprep.subr.bf16.mxu0 %v1657_v33  ;;  %1690 = vmatprep.subr.bf16.mxu1 %v1689_v36  ;;  %v583_v33 = vld [vmem:[#allocation6 + $0x5b0] sm:$0xff]  ;;  %v584_v36 = vld [vmem:[#allocation6 + $0x5b8] sm:$0xff]  ;;  %v1735_v39 = vpack.c.bf16 %v566_v28, %v565_v27  ;;  %v573_v28 = vld [vmem:[#allocation6 + $0x560] sm:$0xff] }
  0x99   : > { %v1737_v42 = vpack.c.bf16 %v584_v36, %v583_v33  ;;  %v560_v33 = vld [vmem:[#allocation6 + $0x4f8] sm:$0xff]  ;;  %v591_v36 = vld [vmem:[#allocation6 + $0x5f0] sm:$0xff]  ;;  %v610_v45 = vld [vmem:[#allocation6 + $0x688] sm:$0xff]  ;;  %vm340_vm10 = vcmp.lt.s32.totalorder %v336_v56, 16 }
  0x9a   : > { %v594_v52 = vld [vmem:[#allocation6 + $0x608] sm:$0xff] }
  0x9b   : > { %1660 = vmatpush3.bf16.msra.mxu0 %v1659_v43  ;;  %1692 = vmatpush3.bf16.msra.mxu1 %v1691_v44  ;;  %v567_v43 = vld [vmem:[#allocation6 + $0x530] sm:$0xff]  ;;  %v568_v44 = vld [vmem:[#allocation6 + $0x538] sm:$0xff] }
  0x9c   : > { %1694 = vmatprep.subr.bf16.mxu0 %v1693_v49  ;;  %1726 = vmatprep.subr.bf16.mxu1 %v1725_v50  ;;  %v586_v49 = vld [vmem:[#allocation6 + $0x5c8] sm:$0xff]  ;;  %v1739_v51 = vpack.c.bf16 %v568_v44, %v567_v43  ;;  %v576_v43 = vld [vmem:[#allocation6 + $0x578] sm:$0xff]  ;;  %v609_v44 = vld [vmem:[#allocation6 + $0x680] sm:$0xff] }
  0x9d   : > { %v1741_v60 = vpack.c.bf16 %v586_v49, %v585_v48 }
  0x9e   : > { %1279 = vmatmul.mubr.msk.f32.vlgmr.msra.gmra.mrb[4].mxu0 %vm312_vm6, %v308_v0  ;;  %1281 = vmatmul.mubr.msk.f32.vlgmr.msra.gmra.mrb[4].mxu1 %vm213_vm0, %v2249_v8  ;;  %v1701_v8 = vpack.c.bf16 %v550_v13, %v549_v7  ;;  %v555_v0 = vld [vmem:[#allocation6 + $0x4d0] sm:$0xff]  ;;  %v572_v13 = vld [vmem:[#allocation6 + $0x558] sm:$0xff] }
  0x9f   : > { %1696 = vmatpush3.bf16.msra.mxu0 %v1695_v14  ;;  %1728 = vmatpush3.bf16.msra.mxu1 %v1727_v1  ;;  %v556_v14 = vld [vmem:[#allocation6 + $0x4d8] sm:$0xff]  ;;  %v587_v1 = vld [vmem:[#allocation6 + $0x5d0] sm:$0xff] }
  0xa0   : > { %846 = vmatprep.mubr.f32.mxu0 %v307_v10  ;;  %1698 = vmatprep.subr.bf16.mxu0 %v1697_v3  ;;  %v1743_v3 = vpack.c.bf16 %v570_v63, %v569_v61  ;;  %v1713_v7 = vpack.c.bf16 %v556_v14, %v555_v0  ;;  %v1745_v10 = vpack.c.bf16 %v588_v16, %v587_v1  ;;  %v361_v61 = vadd.s32 2, %v250_v47  ;;  %v595_v14 = vld [vmem:[#allocation6 + $0x610] sm:$0xff]  ;;  %v596_v1 = vld [vmem:[#allocation6 + $0x618] sm:$0xff] }
  0xa1   : > { %1730 = vmatprep.subr.bf16.mxu1 %v1729_v11  ;;  %1282 = vmatprep.mubr.msk.f32.mxu1 %vm213_vm0, %v2268_v19  ;;  %v357_v19 = vsel %vm355_vm8, %v352_v22, %v354_v23  ;;  %v571_v11 = vld [vmem:[#allocation6 + $0x550] sm:$0xff]  ;;  %v334_v16 = vsel %vm330_vm7, %v329_v21, %v327_v18  ;;  %v1763_v18 = vpack.c.bf16 %v596_v1, %v595_v14 }
  0xa2   : > { %847 = vmatmul.mubr.f32.gmra.mrb[6].mxu0 %v306_v57  ;;  %1283 = vmatmul.mubr.msk.f32.gmra.mrb[6].mxu1 %vm213_vm0, %v2252_v9  ;;  %v536_v9 = vld [vmem:[#allocation6 + $0x438] sm:$0xff]  ;;  %v589_v57 = vld [vmem:[#allocation6 + $0x5e0] sm:$0xff]  ;;  %v1747_v54 = vpack.c.bf16 %v572_v13, %v571_v11  ;;  %vm365_vm11 = vcmp.lt.s32.totalorder %v361_v61, 16  ;;  %v618_v11 = vld [vmem:[#allocation6 + $0x6c8] sm:$0xff] }
  0xa3   : > { %1700 = vmatpush3.bf16.msra.mxu0 %v1699_v58  ;;  %1732 = vmatpush3.bf16.msra.mxu1 %v1731_v24  ;;  %v1707_v50 = vpack.c.bf16 %v536_v9, %v535_v40  ;;  %v590_v58 = vld [vmem:[#allocation6 + $0x5e8] sm:$0xff]  ;;  %v1715_v24 = vpack.c.bf16 %v540_v6, %v539_v5  ;;  %v1721_v40 = vpack.c.bf16 %v560_v33, %v559_v32  ;;  %v2416_v6 = vadd.s32 3, %v250_v47  ;;  %v601_v13 = vld [vmem:[#allocation6 + $0x640] sm:$0xff]  ;;  %v624_v32 = vld [vmem:[#allocation6 + $0x6f8] sm:$0xff] }
  0xa4   : > { %1702 = vmatprep.subr.bf16.mxu0 %v1701_v8  ;;  %1734 = vmatprep.subr.bf16.mxu1 %v1733_v26  ;;  %v542_v8 = vld [vmem:[#allocation6 + $0x468] sm:$0xff]  ;;  %v1717_v26 = vpack.c.bf16 %v558_v17, %v557_v15  ;;  %v1749_v27 = vpack.c.bf16 %v590_v58, %v589_v57  ;;  %v359_v5 = vsel %vm355_vm8, %v354_v23, %v352_v22  ;;  %v599_v22 = vld [vmem:[#allocation6 + $0x630] sm:$0xff]  ;;  %v600_v23 = vld [vmem:[#allocation6 + $0x638] sm:$0xff] }
  0xa5   : > { %991 = vmatprep.mubr.f32.mxu0 %v332_v37  ;;  %1066 = vmatprep.mubr.f32.mxu1 %v357_v19  ;;  %v592_v37 = vld [vmem:[#allocation6 + $0x5f8] sm:$0xff]  ;;  %v1719_v19 = vpack.c.bf16 %v542_v8, %v541_v25  ;;  %vm390_vm12 = vcmp.lt.s32.totalorder %v2416_v6, 16  ;;  %v602_v15 = vld [vmem:[#allocation6 + $0x648] sm:$0xff]  ;;  %v619_v17 = vld [vmem:[#allocation6 + $0x6d0] sm:$0xff] }
  0xa6   : > { %v1753_v9 = vpack.c.bf16 %v592_v37, %v591_v36  ;;  %v620_v57 = vld [vmem:[#allocation6 + $0x6d8] sm:$0xff]  ;;  %v1775_v58 = vpack.c.bf16 %v602_v15, %v601_v13  ;;  %v621_v25 = vld [vmem:[#allocation6 + $0x6e0] sm:$0xff]  ;;  %v607_v37 = vld [vmem:[#allocation6 + $0x670] sm:$0xff] }
  0xa7   : > { %1704 = vmatpush3.bf16.msra.mxu0 %v1703_v38  ;;  %1736 = vmatpush3.bf16.msra.mxu1 %v1735_v39  ;;  %v1751_v38 = vpack.c.bf16 %v574_v30, %v573_v28  ;;  %v543_v39 = vld [vmem:[#allocation6 + $0x470] sm:$0xff]  ;;  %v606_v28 = vld [vmem:[#allocation6 + $0x668] sm:$0xff] }
  0xa8   : > { %1706 = vmatprep.subr.bf16.mxu0 %v1705_v41  ;;  %1738 = vmatprep.subr.bf16.mxu1 %v1737_v42  ;;  %v544_v41 = vld [vmem:[#allocation6 + $0x478] sm:$0xff]  ;;  %v575_v42 = vld [vmem:[#allocation6 + $0x570] sm:$0xff] }
  0xa9   : > { %v1723_v48 = vpack.c.bf16 %v544_v41, %v543_v39  ;;  %v1755_v49 = vpack.c.bf16 %v576_v43, %v575_v42  ;;  %v623_v30 = vld [vmem:[#allocation6 + $0x6f0] sm:$0xff] }
  0xaa   : > { %v1785_v36 = vpack.c.bf16 %v624_v32, %v623_v30 }
  0xab   : > { %1708 = vmatpush3.bf16.msra.mxu0 %v1707_v50  ;;  %1740 = vmatpush3.bf16.msra.mxu1 %v1739_v51  ;;  %v1757_v50 = vpack.c.bf16 %v610_v45, %v609_v44  ;;  %v593_v51 = vld [vmem:[#allocation6 + $0x600] sm:$0xff] }
  0xac   : > { %1710 = vmatprep.subr.bf16.mxu0 %v1709_v59  ;;  %1742 = vmatprep.subr.bf16.mxu1 %v1741_v60  ;;  %v611_v59 = vld [vmem:[#allocation6 + $0x690] sm:$0xff]  ;;  %v612_v60 = vld [vmem:[#allocation6 + $0x698] sm:$0xff]  ;;  %v1759_v63 = vpack.c.bf16 %v594_v52, %v593_v51 }
  0xad   : > { %v1761_v0 = vpack.c.bf16 %v612_v60, %v611_v59 }
  0xaf   : > { %1712 = vmatpush3.bf16.msra.mxu0 %v1711_v2  ;;  %1744 = vmatpush3.bf16.msra.mxu1 %v1743_v3  ;;  %v613_v2 = vld [vmem:[#allocation6 + $0x6a0] sm:$0xff]  ;;  %v614_v3 = vld [vmem:[#allocation6 + $0x6a8] sm:$0xff] }
  0xb0   : > { %1714 = vmatprep.subr.bf16.mxu0 %v1713_v7  ;;  %1746 = vmatprep.subr.bf16.mxu1 %v1745_v10  ;;  %v1765_v21 = vpack.c.bf16 %v614_v3, %v613_v2  ;;  %v598_v7 = vld [vmem:[#allocation6 + $0x628] sm:$0xff]  ;;  %v617_v10 = vld [vmem:[#allocation6 + $0x6c0] sm:$0xff] }
  0xb3   : > { %1716 = vmatpush3.bf16.msra.mxu0 %v1715_v24  ;;  %1748 = vmatpush3.bf16.msra.mxu1 %v1747_v54  ;;  %v603_v24 = vld [vmem:[#allocation6 + $0x650] sm:$0xff]  ;;  %v604_v54 = vld [vmem:[#allocation6 + $0x658] sm:$0xff] }
  0xb4   : > { %1718 = vmatprep.subr.bf16.mxu0 %v1717_v26  ;;  %1750 = vmatprep.subr.bf16.mxu1 %v1749_v27  ;;  %v1779_v8 = vpack.c.bf16 %v604_v54, %v603_v24  ;;  %v605_v27 = vld [vmem:[#allocation6 + $0x660] sm:$0xff] }
  0xb5   : > { %v1783_v33 = vpack.c.bf16 %v606_v28, %v605_v27 }
  0xb7   : > { %1720 = vmatpush3.bf16.msra.mxu0 %v1719_v19  ;;  %1752 = vmatpush3.bf16.msra.mxu1 %v1751_v38  ;;  %v608_v19 = vld [vmem:[#allocation6 + $0x678] sm:$0xff] }
  0xb8   : > { %1722 = vmatprep.subr.bf16.mxu0 %v1721_v40  ;;  %1754 = vmatprep.subr.bf16.mxu1 %v1753_v9  ;;  %v1787_v38 = vpack.c.bf16 %v608_v19, %v607_v37  ;;  %v626_v9 = vstv %s625_s19 }
  0xbb   : > { %1724 = vmatpush3.bf16.msra.mxu0 %v1723_v48  ;;  %1756 = vmatpush3.bf16.msra.mxu1 %v1755_v49 }
  0xbc   : > { %1758 = vmatprep.subr.bf16.mxu0 %v1757_v50  ;;  %1789 = vmatprep.subr.bf16.mxu1 %v1757_v50 }
  0xbe   : > { %992 = vmatmul.mubr.f32.vlgmr.msra.gmra.mrb[8].mxu0 %v2330_v34  ;;  %1067 = vmatmul.mubr.f32.vlgmr.msra.gmra.mrb[8].mxu1 %v2339_v12  ;;  %v597_v34 = vld [vmem:[#allocation6 + $0x620] sm:$0xff]  ;;  %v616_v12 = vld [vmem:[#allocation6 + $0x6b8] sm:$0xff] }
  0xbf   : > { %1760 = vmatpush3.bf16.msra.mxu0 %v1759_v63  ;;  %1797 = vmatpush3.bf16.msra.mxu1 %v1759_v63  ;;  %v1767_v29 = vpack.c.bf16 %v598_v7, %v597_v34  ;;  %v1769_v31 = vpack.c.bf16 %v616_v12, %v615_v20 }
  0xc0   : > { %1284 = vmatprep.mubr.msk.f32.mxu0 %vm340_vm10, %v334_v16  ;;  %1762 = vmatprep.subr.bf16.mxu0 %v1761_v0 }
  0xc1   : > { %1790 = vmatprep.subr.bf16.mxu1 %v1761_v0  ;;  %1286 = vmatprep.mubr.msk.f32.mxu1 %vm365_vm11, %v359_v5 }
  0xc2   : > { %1285 = vmatmul.mubr.msk.f32.gmra.mrb[10].mxu0 %vm340_vm10, %v2334_v35  ;;  %1287 = vmatmul.mubr.msk.f32.gmra.mrb[10].mxu1 %vm365_vm11, %v2344_v46  ;;  %v1771_v35 = vpack.c.bf16 %v600_v23, %v599_v22  ;;  %v1773_v46 = vpack.c.bf16 %v618_v11, %v617_v10 }
  0xc3   : > { %1764 = vmatpush3.bf16.msra.mxu0 %v1763_v18  ;;  %1798 = vmatpush3.bf16.msra.mxu1 %v1763_v18 }
  0xc4   : > { %1766 = vmatprep.subr.bf16.mxu0 %v1765_v21  ;;  %1791 = vmatprep.subr.bf16.mxu1 %v1765_v21 }
  0xc5   : > { %1141 = vmatprep.mubr.f32.mxu0 %v2351_v53  ;;  %1288 = vmatprep.mubr.msk.f32.mxu1 %vm390_vm12, %v2355_v55  ;;  %v1777_v53 = vpack.c.bf16 %v620_v57, %v619_v17  ;;  %v622_v55 = vld [vmem:[#allocation6 + $0x6e8] sm:$0xff] }
  0xc6   : > { %v1781_v26 = vpack.c.bf16 %v622_v55, %v621_v25 }
  0xc7   : > { %1768 = vmatpush3.bf16.msra.mxu0 %v1767_v29  ;;  %1799 = vmatpush3.bf16.msra.mxu1 %v1767_v29 }
  0xc8   : > { %1770 = vmatprep.subr.bf16.mxu0 %v1769_v31  ;;  %1792 = vmatprep.subr.bf16.mxu1 %v1769_v31 }
  0xcb   : > { %1772 = vmatpush3.bf16.msra.mxu0 %v1771_v35  ;;  %1800 = vmatpush3.bf16.msra.mxu1 %v1771_v35 }
  0xcc   : > { %1774 = vmatprep.subr.bf16.mxu0 %v1773_v46  ;;  %1793 = vmatprep.subr.bf16.mxu1 %v1773_v46 }
  0xcf   : > { %1776 = vmatpush3.bf16.msra.mxu0 %v1775_v58  ;;  %1801 = vmatpush3.bf16.msra.mxu1 %v1775_v58 }
  0xd0   : > { %1778 = vmatprep.subr.bf16.mxu0 %v1777_v53  ;;  %1794 = vmatprep.subr.bf16.mxu1 %v1777_v53 }
  0xd3   : > { %1780 = vmatpush3.bf16.msra.mxu0 %v1779_v8  ;;  %1802 = vmatpush3.bf16.msra.mxu1 %v1779_v8 }
  0xd4   : > { %1782 = vmatprep.subr.bf16.mxu0 %v1781_v26  ;;  %1795 = vmatprep.subr.bf16.mxu1 %v1781_v26 }
  0xd7   : > { %1784 = vmatpush3.bf16.msra.mxu0 %v1783_v33  ;;  %1803 = vmatpush3.bf16.msra.mxu1 %v1783_v33 }
  0xd8   : > { %1786 = vmatprep.subr.bf16.mxu0 %v1785_v36  ;;  %1796 = vmatprep.subr.bf16.mxu1 %v1785_v36 }
  0xdb   : > { %1788 = vmatpush3.bf16.msra.mxu0 %v1787_v38  ;;  %1804 = vmatpush3.bf16.msra.mxu1 %v1787_v38 }
  0xde   : > { %1142 = vmatmul.mubr.f32.vlgmr.msra.gmra.mrb[12].mxu0 %v2359_v62  ;;  %1289 = vmatmul.mubr.msk.f32.vlgmr.msra.gmra.mrb[12].mxu1 %vm390_vm12, %v2363_v4 }
 0x151   : > { %v1331_v39 = vpop.f32.mrb[0].mxu0  ;;  %v1369_v40 = vpop.f32.mrb[0].mxu1 }
 0x152   : > { %v1332_v41 = vpop.f32.mrb[1].mxu0  ;;  %v1370_v42 = vpop.f32.mrb[1].mxu1 }
 0x153   : > { %v1333_v43 = vadd.f32 %v1332_v41, %v1331_v39  ;;  %v1371_v44 = vadd.f32 %v1370_v42, %v1369_v40 }
 0x155   : > { %v694_v45 = vadd.f32 %v1333_v43, %v626_v9  ;;  %v1334_v47 = vpop.f32.mrb[2].mxu0  ;;  %v1372_v48 = vpop.f32.mrb[2].mxu1 }
 0x156   : > { %v1335_v49 = vpop.f32.mrb[3].mxu0  ;;  %v1373_v50 = vpop.f32.mrb[3].mxu1 }
 0x157   : > { %v769_v51 = vadd.f32 %v1371_v44, %v694_v45  ;;  %v1336_v52 = vadd.f32 %v1335_v49, %v1334_v47  ;;  %v1374_v62 = vadd.f32 %v1373_v50, %v1372_v48 }
 0x159   : > { %v699_v56 = vadd.f32 %v1336_v52, %v626_v9 }
 0x15b   : > { %v774_v59 = vadd.f32 %v1374_v62, %v699_v56 }
 0x171   : > { %v1407_v60 = vpop.f32.mrb[4].mxu0  ;;  %v1445_v4 = vpop.f32.mrb[4].mxu1 }
 0x172   : > { %v1408_v61 = vpop.f32.mrb[5].mxu0  ;;  %v1446_v63 = vpop.f32.mrb[5].mxu1 }
 0x173   : > { %v1409_v0 = vadd.f32 %v1408_v61, %v1407_v60  ;;  %v1447_v14 = vadd.f32 %v1446_v63, %v1445_v4 }
 0x175   : > { %v844_v1 = vadd.f32 %v1409_v0, %v769_v51  ;;  %v1410_v16 = vpop.f32.mrb[6].mxu0  ;;  %v1448_v2 = vpop.f32.mrb[6].mxu1 }
 0x176   : > { %v1411_v3 = vpop.f32.mrb[7].mxu0  ;;  %v1449_v5 = vpop.f32.mrb[7].mxu1 }
 0x177   : > { %v919_v6 = vadd.f32 %v1447_v14, %v844_v1  ;;  %v1412_v18 = vadd.f32 %v1411_v3, %v1410_v16  ;;  %v1450_v21 = vadd.f32 %v1449_v5, %v1448_v2 }
 0x179   : > { %v849_v34 = vadd.f32 %v1412_v18, %v774_v59 }
 0x17b   : > { %v924_v7 = vadd.f32 %v1450_v21, %v849_v34 }
 0x191   : > { %v1483_v20 = vpop.f32.mrb[8].mxu0  ;;  %v1521_v12 = vpop.f32.mrb[8].mxu1 }
 0x192   : > { %v1484_v29 = vpop.f32.mrb[9].mxu0  ;;  %v1522_v31 = vpop.f32.mrb[9].mxu1 }
 0x193   : > { %v1485_v22 = vadd.f32 %v1484_v29, %v1483_v20  ;;  %v1523_v23 = vadd.f32 %v1522_v31, %v1521_v12 }
 0x195   : > { %v994_v10 = vadd.f32 %v1485_v22, %v919_v6  ;;  %v1486_v11 = vpop.f32.mrb[10].mxu0  ;;  %v1524_v35 = vpop.f32.mrb[10].mxu1 }
 0x196   : > { %v1487_v46 = vpop.f32.mrb[11].mxu0  ;;  %v1525_v13 = vpop.f32.mrb[11].mxu1 }
 0x197   : > { %v1069_v15 = vadd.f32 %v1523_v23, %v994_v10  ;;  %v1488_v17 = vadd.f32 %v1487_v46, %v1486_v11  ;;  %v1526_v57 = vadd.f32 %v1525_v13, %v1524_v35 }
 0x199   : > { %v999_v58 = vadd.f32 %v1488_v17, %v924_v7 }
 0x19b   : > { %v1074_v53 = vadd.f32 %v1526_v57, %v999_v58 }
 0x1b1   : > { %v1559_v24 = vpop.f32.mrb[12].mxu0  ;;  %v1562_v54 = vpop.f32.mrb[12].mxu1 }
 0x1b2   : > { %v1560_v25 = vpop.f32.mrb[13].mxu0  ;;  %v1563_v55 = vpop.f32.mrb[13].mxu1 }
 0x1b3   : > { %v1561_v8 = vadd.f32 %v1560_v25, %v1559_v24  ;;  %v1564_v26 = vadd.f32 %v1563_v55, %v1562_v54 }
 0x1b5   : > { %v1144_v27 = vadd.f32 %v1561_v8, %v1069_v15  ;;  %v1149_v28 = vadd.f32 %v1564_v26, %v1074_v53 }
 0x1b7   : > { %v1290_v30 = vmul.f32 -1.442695, %v1144_v27  ;;  %v1291_v32 = vmul.f32 -1.442695, %v1149_v28 }
 0x1b9   : > { %1866 = vpow2.f32 %v1290_v30 }
 0x1ba   : > { %1868 = vpow2.f32 %v1291_v32 }
 0x1c3   : > { %v1867_v33 = vpop.eup %1866 }
 0x1c4   : > { %v1869_v36 = vpop.eup %1868  ;;  %v1158_v37 = vadd.f32 1.0, %v1867_v33 }
 0x1c5   : > { %v1159_v19 = vadd.f32 1.0, %v1869_v36 }
 0x1c6   : > { %1870 = vrcp.f32 %v1158_v37 }
 0x1c7   : > { %1872 = vrcp.f32 %v1159_v19 }
 0x1d0   : > { %v1871_v38 = vpop.eup %1870 }
 0x1d1   : > { %v1873_v39 = vpop.eup %1872  ;;  %1164 = vst [vmem:[%s204_s10] sm:$0xff] %v1871_v38 }
 0x1d2   : > { %1165 = vst [vmem:[%s204_s10 + $0x8] sm:$0xff] %v1873_v39 }
 0x1d3   : > { %1945 = shalt.err (!%p1942_p7)
}
 0x1d4   : > { %s1946_s28 = scalar_lea.hbm %s2436_s5, 256  ;;  %s1950_s6 = scalar_lea.hbm %s2485_s3, 512 }
 0x1d5   : > { %p1947_p9 = scmp.ne.s32.totalorder %s2436_s5, %s1946_s28  ;;  %p1951_p5 = scmp.lt.u32.totalorder %s2436_s5, %s2485_s3 }
 0x1d6   : > { %p1952_p11 = scmp.lt.u32.totalorder %s1950_s6, %s1946_s28  ;;  %p1954_p4 = scmp.lt.u32.totalorder %s1946_s28, %s2436_s5 }
 0x1d7   : > { %p1948_p1 = pnand %p1947_p9, %p2128_p12 }
 0x1d8   : > { %p1953_p2 = por %p1952_p11, %p1951_p5 }
 0x1d9   : > { %p1949_p0 = pneg %p1948_p1 }
 0x1da   : > { %p1955_p6 = por %p1954_p4, %p1953_p2 }
 0x1dc   : > { %p1956_p8 = pnand %p1955_p6, %p1949_p0 }
 0x1de   : > { %1959 = shalt.err (!%p1956_p8)
}
 0x1df   : > { %s2009_s19 = smov 128   ;;  %s2010_s21 = smov 8  }
 0x1e0   : > { %1811 = dma.vmem_to_hbm [thread:$0]  (%p2128_p12), %s2438_s4, 256, %s2436_s5, %s1167_s11, %s2009_s19, %s2009_s19, %s2010_s21  }
 0x1e1 PF: > { %s1195_s9 = sand.u32 1, %s1990_s14   ;;  %p2500_p10 = scmp.ne.s32.totalorder %s2490_s20, 0 }
 0x1e2   : > { %p2501_p13 = scmp.ge.s32.totalorder %s2002_s17, 2  ;;  %s1196_s10 = scalar_lea.sflag [#allocation5], %s1195_s9 }
 0x1e4   : > { %p1822_p3 = pnand %p2501_p13, %p2500_p10 }
 0x1e6   : > { %1985 = dma.done.wait (!%p1822_p3), %s1196_s10, 256  }
 0x1e7   : > { %1987 = vsyncadd (!%p1822_p3), %s1196_s10, 4294967040  ;;  %p18_p7 = scmp.ge.s32.totalorder %s2090_s25, 4   ;;  %s2502_s14 = smov %s1994_s15 }
 0x1e8   : > { %s2503_s15 = smov %s1998_s16  ;;  %s2504_s16 = smov %s2124_s13 }
 0x1e9   : > { %s2505_s17 = smov %s2090_s25  ;;  %20 = sbr.rel (!%p18_p7) target bundleno = 8 (0x8), region = 81 }
 0x1f0   :  { %1201 = vsyncpa [#allocation4], 1 }
 0x1f1   :  { %1203 = vsyncpa [#allocation4 + $0x1], 1 }
 0x1f2   :  { %1204 = vsyncpa [#allocation7], 1 }
 0x1f3   :  { %1205 = vsyncpa [#allocation5], 1 }
 0x1f4   :  { %1207 = vsyncpa [#allocation5 + $0x1], 1 }

</bundles_post_ra>
